<compile_context>
chip_gen: v5e
topology: v5e:2x2
jax: 0.10.0
libtpu: 0.0.40
codegen_flags: <defaults>
</compile_context>

<pallas_src>
import jax
import jax.numpy as jnp
from jax import lax
from jax.experimental import pallas as pl
from jax.experimental.pallas import tpu as pltpu

BN_EPS = 1e-5          # PyTorch BatchNorm2d default eps
LANE = 128


# ------------------------------ small helpers ------------------------------
def _round_up(x, m):
    return (x + m - 1) // m * m


def _pad_last(a, target, fill=0.0):
    pad = target - a.shape[-1]
    if pad == 0:
        return a
    widths = [(0, 0)] * (a.ndim - 1) + [(0, pad)]
    return jnp.pad(a, widths, constant_values=fill)


def _vmem_budget():
    """Generation-aware (tiling_budget_bytes, vmem_limit_bytes)."""
    try:
        cap = int(pltpu.get_tpu_info().vmem_capacity_bytes)
    except Exception:                       # unknown generation / no query
        cap = None
    if cap is not None and cap >= 96 * 1024 * 1024:
        # v5e / v6e: 128 MiB physical VMEM per TensorCore.
        return 44 * 1024 * 1024, 72 * 1024 * 1024
    # v7x (64 MiB per TensorCore) or unknown: stay conservative.
    return 24 * 1024 * 1024, 44 * 1024 * 1024


def _pick_tr(ho, wo, cin, cpad, budget, force_tr=None):
    """Output-row tile for the halo-window conv kernel: the largest divisor of
    ho whose conv-pass or apply-pass working set fits the VMEM budget.  The
    two passes are separate pallas_calls, so we take the max, not the sum."""
    if force_tr is not None:
        assert ho % force_tr == 0
        return force_tr
    for tr in range(ho, 0, -1):
        if ho % tr:
            continue
        r = tr * wo
        conv_need = (2 * (tr + 2) * (wo + 2) * cin * 2     # in tiles (x2 bufs)
                     + 2 * 9 * cin * cpad * 2              # resident weights
                     + 2 * r * cpad * 2                    # bf16 out tiles
                     + 2 * 2 * cpad * 4                    # stats tiles
                     + 2 * r * cpad * 4                    # f32 accumulator + slack
                     + (tr + 2) * (wo + 2) * cin * 2)      # tap temporaries
        apply_need = (2 * 2 * r * cpad * 2                 # y + residual (bf16)
                      + 2 * r * cpad * 4                   # f32 out tiles
                      + 2 * r * cpad * 4                   # elementwise temps
                      + 16 * cpad * 4)                     # scale/shift vectors
        if max(conv_need, apply_need) <= budget:
            return tr
    return 1


def _pick_tm(m, k, cin, cpad, budget, force_tm=None):
    """Row tile for the stride-2 patch-GEMM pass.  Prefers divisors of m so
    the outputs need no row padding (keeps downstream reshapes copy-free)."""
    if force_tm is not None:
        assert force_tm % 8 == 0
        return force_tm
    cap = max(8, _round_up(m, 8))
    cands = [t for t in (4096, 2048, 1024, 512, 256, 128, 64, 32, 16, 8)
             if t <= cap]
    if cap not in cands:
        cands.insert(0, cap)
    fitting = []
    for tm in cands:                                        # descending
        need = (2 * tm * k * 2 + 2 * tm * cin * 2           # patch + centre tiles
                + 2 * (k + cin) * cpad * 2                  # resident weights
                + 2 * 2 * tm * cpad * 2                     # two bf16 outputs
                + 2 * 4 * cpad * 4                          # stats
                + 2 * tm * cpad * 4)                        # f32 accumulators
        if need <= budget:
            fitting.append(tm)
    if not fitting:
        return 8
    for tm in fitting:
        if m % tm == 0:
            return tm
    return fitting[0]


def _im2col(x, ksize, stride, pad):
    """x: [N,H,W,C] -> patches [N*Ho*Wo, ksize*ksize*C] (stride-2 conv1 only)."""
    n, h, w, c = x.shape
    xp = jnp.pad(x, ((0, 0), (pad, pad), (pad, pad), (0, 0)))
    ho = (h + 2 * pad - ksize) // stride + 1
    wo = (w + 2 * pad - ksize) // stride + 1
    cols = []
    for dy in range(ksize):
        for dx in range(ksize):
            cols.append(
                xp[:, dy:dy + stride * (ho - 1) + 1:stride,
                   dx:dx + stride * (wo - 1) + 1:stride, :])
    patches = jnp.concatenate(cols, axis=-1)
    return patches.reshape(n * ho * wo, ksize * ksize * c)


def _halo_window(x_img, tr):
    """[N,H,W,C] -> halo row tiles [N*(H//tr), tr+2, W+2, C].  The zero border
    is the conv's padding=1; only the 2 halo rows per tile get duplicated."""
    n, h, w, c = x_img.shape
    assert h % tr == 0
    n_rt = h // tr
    xp = jnp.pad(x_img, ((0, 0), (1, 1), (1, 1), (0, 0)))
    tiles = [xp[:, i * tr:i * tr + tr + 2] for i in range(n_rt)]
    xt = jnp.stack(tiles, axis=1)                  # [N, n_rt, tr+2, W+2, C]
    return xt.reshape(n * n_rt, tr + 2, w + 2, c)


# ----------------------------- Pallas kernels ------------------------------
def _make_conv3x3_s1_kernel(tr, wo, cin, cpad):
    r = tr * wo

    def kernel(x_ref, w_ref, y_ref, st_ref):
        """3x3/stride-1 conv of one halo row tile as nine shifted MXU taps
        (bf16 operands, f32 accumulation) + per-tile BN statistics."""
        xt = x_ref[0]                                  # (tr+2, wo+2, cin) bf16
        acc = None
        for dy in range(3):
            for dx in range(3):
                tap = xt[dy:dy + tr, dx:dx + wo, :].reshape(r, cin)
                part = jnp.dot(tap, w_ref[3 * dy + dx],
                               preferred_element_type=jnp.float32)
                acc = part if acc is None else acc + part
        # stats from the f32 accumulator, before the bf16 cast
        st_ref[0] = jnp.concatenate(
            [jnp.sum(acc, axis=0, keepdims=True),
             jnp.sum(acc * acc, axis=0, keepdims=True)], axis=0)
        y_ref[0] = acc.astype(y_ref.dtype)

    return kernel


def _dsconv_kernel(p_ref, c_ref, w_ref, ws_ref, y_ref, s_ref, st_ref):
    """Downsample-branch pass A: 3x3/stride-2 conv1 as a patch GEMM plus the
    fused 1x1/stride-2 shortcut as its own small GEMM on the centre-tap input
    (K = c_in, no 8/9-zero weight rows), both with per-tile BN statistics."""
    y = jnp.dot(p_ref[...], w_ref[...], preferred_element_type=jnp.float32)
    s = jnp.dot(c_ref[...], ws_ref[...], preferred_element_type=jnp.float32)
    st_ref[0] = jnp.concatenate(
        [jnp.sum(y, axis=0, keepdims=True),
         jnp.sum(y * y, axis=0, keepdims=True),
         jnp.sum(s, axis=0, keepdims=True),
         jnp.sum(s * s, axis=0, keepdims=True)], axis=0)
    y_ref[...] = y.astype(y_ref.dtype)
    s_ref[...] = s.astype(s_ref.dtype)


def _apply_res_kernel(y_ref, r_ref, sc_ref, sh_ref, rsc_ref, rsh_ref, o_ref):
    """Final pass: BN2 affine + ReLU, shortcut-BN, residual add, final ReLU."""
    h = jnp.maximum(
        y_ref[0].astype(jnp.float32) * sc_ref[...] + sh_ref[...], 0.0)
    res = r_ref[0].astype(jnp.float32) * rsc_ref[...] + rsh_ref[...]
    o_ref[0] = jnp.maximum(h + res, 0.0)


# ----------------------------- kernel wrappers ------------------------------
def _conv3x3_s1_stats(x_img, w9, tr, vmem_limit):
    """x_img: [N,H,W,Cin] bf16, w9: [9,Cin,Cpad] f32.
    Returns y [G, tr*W, Cpad] bf16 and per-tile stats [G, 2, Cpad] f32."""
    n, h, w, cin = x_img.shape
    cpad = w9.shape[-1]
    xt = _halo_window(x_img, tr)
    g = xt.shape[0]
    r = tr * w
    # NOTE: the weight block is constant across the grid; pl.Buffered(1) would
    # single-buffer it but is left at the default for lowering compatibility.
    return pl.pallas_call(
        _make_conv3x3_s1_kernel(tr, w, cin, cpad),
        out_shape=(jax.ShapeDtypeStruct((g, r, cpad), jnp.bfloat16),
                   jax.ShapeDtypeStruct((g, 2, cpad), jnp.float32)),
        grid_spec=pltpu.PrefetchScalarGridSpec(
            num_scalar_prefetch=0,
            grid=(g,),
            in_specs=[pl.BlockSpec((1, tr + 2, w + 2, cin),
                                   lambda i: (i, 0, 0, 0)),
                      pl.BlockSpec((9, cin, cpad), lambda i: (0, 0, 0))],
            out_specs=(pl.BlockSpec((1, r, cpad), lambda i: (i, 0, 0)),
                       pl.BlockSpec((1, 2, cpad), lambda i: (i, 0, 0)))),
        compiler_params=pltpu.CompilerParams(
            dimension_semantics=("parallel",),
            vmem_limit_bytes=vmem_limit),
    )(xt, w9.astype(jnp.bfloat16))


def _dsconv_s2_stats(p1, xc, w1m, wsm, tm, vmem_limit):
    """Stride-2 conv1 + 1x1 shortcut patch-GEMM pass.
    p1 [M, 9*cin], xc [M, cin] -> y1, ysc [M_pad, Cpad] bf16, stats [nt,4,Cpad]."""
    m, k1 = p1.shape
    cin = xc.shape[1]
    cpad = w1m.shape[1]
    m_pad = _round_up(m, tm)
    p1 = p1.astype(jnp.bfloat16)
    xc = xc.astype(jnp.bfloat16)
    if m_pad != m:
        p1 = jnp.pad(p1, ((0, m_pad - m), (0, 0)))
        xc = jnp.pad(xc, ((0, m_pad - m), (0, 0)))
    nt = m_pad // tm
    return pl.pallas_call(
        _dsconv_kernel,
        out_shape=(jax.ShapeDtypeStruct((m_pad, cpad), jnp.bfloat16),
                   jax.ShapeDtypeStruct((m_pad, cpad), jnp.bfloat16),
                   jax.ShapeDtypeStruct((nt, 4, cpad), jnp.float32)),
        grid_spec=pltpu.PrefetchScalarGridSpec(
            num_scalar_prefetch=0,
            grid=(nt,),
            in_specs=[pl.BlockSpec((tm, k1), lambda i: (i, 0)),
                      pl.BlockSpec((tm, cin), lambda i: (i, 0)),
                      pl.BlockSpec((k1, cpad), lambda i: (0, 0)),
                      pl.BlockSpec((cin, cpad), lambda i: (0, 0))],
            out_specs=(pl.BlockSpec((tm, cpad), lambda i: (i, 0)),
                       pl.BlockSpec((tm, cpad), lambda i: (i, 0)),
                       pl.BlockSpec((1, 4, cpad), lambda i: (i, 0, 0)))),
        compiler_params=pltpu.CompilerParams(
            dimension_semantics=("parallel",),
            vmem_limit_bytes=vmem_limit),
    )(p1, xc, w1m.astype(jnp.bfloat16), wsm.astype(jnp.bfloat16))


def _bn_apply_residual(y, res, scale, shift, r_scale, r_shift, vmem_limit):
    """y, res: [G, R, Cpad] bf16 -> relu(bn2(y)) + bn_s(res) -> relu, f32."""
    g, r, cpad = y.shape
    const = pl.BlockSpec((1, cpad), lambda i: (0, 0))
    return pl.pallas_call(
        _apply_res_kernel,
        out_shape=jax.ShapeDtypeStruct((g, r, cpad), jnp.float32),
        grid_spec=pltpu.PrefetchScalarGridSpec(
            num_scalar_prefetch=0,
            grid=(g,),
            in_specs=[pl.BlockSpec((1, r, cpad), lambda i: (i, 0, 0)),
                      pl.BlockSpec((1, r, cpad), lambda i: (i, 0, 0)),
                      const, const, const, const],
            out_specs=pl.BlockSpec((1, r, cpad), lambda i: (i, 0, 0))),
        compiler_params=pltpu.CompilerParams(
            dimension_semantics=("parallel",),
            vmem_limit_bytes=vmem_limit),
    )(y, res, scale, shift, r_scale, r_shift)


# ------------------------------- BN glue -----------------------------------
def _finish_stats(sum_rows, sq_rows, count):
    # One-pass stats; per-tile partials are f32, reduced here (tiny arrays).
    tot = jnp.sum(sum_rows, axis=0, keepdims=True)
    tot_sq = jnp.sum(sq_rows, axis=0, keepdims=True)
    mean = tot / count
    var = jnp.maximum(tot_sq / count - mean * mean, 0.0)   # biased, like BN
    return mean, var


def _bn_scale_shift(gamma, beta, mean, var):
    scale = gamma * lax.rsqrt(var + BN_EPS)
    shift = beta - mean * scale
    return scale, shift


# ------------------------------- forward pass ------------------------------
def init_params(key, c_in, c_out, downsample):
    ks = jax.random.split(key, 12)
    p = {
        "w1": 0.1 * jax.random.normal(ks[0], (3, 3, c_in, c_out), jnp.float32),
        "b1": 0.1 * jax.random.normal(ks[1], (1, c_out), jnp.float32),
        "w2": 0.1 * jax.random.normal(ks[2], (3, 3, c_out, c_out), jnp.float32),
        "b2": 0.1 * jax.random.normal(ks[3], (1, c_out), jnp.float32),
        "bn1_g": 1.0 + 0.1 * jax.random.normal(ks[4], (1, c_out), jnp.float32),
        "bn1_b": 0.1 * jax.random.normal(ks[5], (1, c_out), jnp.float32),
        "bn2_g": 1.0 + 0.1 * jax.random.normal(ks[6], (1, c_out), jnp.float32),
        "bn2_b": 0.1 * jax.random.normal(ks[7], (1, c_out), jnp.float32),
    }
    if downsample:
        p["ws"] = 0.1 * jax.random.normal(ks[8], (1, 1, c_in, c_out), jnp.float32)
        p["bs"] = 0.1 * jax.random.normal(ks[9], (1, c_out), jnp.float32)
        p["bns_g"] = 1.0 + 0.1 * jax.random.normal(ks[10], (1, c_out), jnp.float32)
        p["bns_b"] = 0.1 * jax.random.normal(ks[11], (1, c_out), jnp.float32)
    return p


def resblock_forward(x, params, downsample, force_tr=None, force_tm=None):
    """x: [N, H, W, C_in] float32 (NHWC).  Training-mode BN (batch stats)."""
    n, h, w, c_in = x.shape
    c_out = params["w1"].shape[-1]
    c_pad = _round_up(c_out, LANE)            # lane-dense output channels
    budget, vmem_limit = _vmem_budget()

    ho, wo = ((h + 1) // 2, (w + 1) // 2) if downsample else (h, w)
    m = n * ho * wo
    tr = _pick_tr(ho, wo, c_pad, c_pad, budget, force_tr)

    g1 = _pad_last(params["bn1_g"], c_pad, 1.0)
    be1 = _pad_last(params["bn1_b"], c_pad)
    g2 = _pad_last(params["bn2_g"], c_pad, 1.0)
    be2 = _pad_last(params["bn2_b"], c_pad)

    # Conv biases are intentionally not applied in the kernels: a conv bias
    # immediately normalized by training-mode BN cancels exactly.

    if downsample:
        # -------- pass A: stride-2 conv1 + fused 1x1 shortcut (patch GEMM) --
        p1 = _im2col(x, 3, 2, 1)                       # [m, 9*c_in]
        xc = x[:, ::2, ::2, :].reshape(m, c_in)        # centre tap for 1x1
        w1m = _pad_last(params["w1"].reshape(9 * c_in, c_out), c_pad)
        wsm = _pad_last(params["ws"].reshape(c_in, c_out), c_pad)
        tm = _pick_tm(m, 9 * c_in, c_in, c_pad, budget, force_tm)
        y1_flat, ysc_flat, st1 = _dsconv_s2_stats(p1, xc, w1m, wsm, tm,
                                                  vmem_limit)
        # padded rows are all-zero inputs -> zero outputs -> stats need no fixup
        mean1, var1 = _finish_stats(st1[:, 0, :], st1[:, 1, :], m)
        mean_s, var_s = _finish_stats(st1[:, 2, :], st1[:, 3, :], m)
        scale_s, shift_s = _bn_scale_shift(
            _pad_last(params["bns_g"], c_pad, 1.0),
            _pad_last(params["bns_b"], c_pad), mean_s, var_s)
        y1_img = y1_flat[:m].reshape(n, ho, wo, c_pad)
        res = ysc_flat[:m]                              # bf16 residual [m, Cpad]
    else:
        assert c_in == c_out, "identity shortcut needs in_channels == out_channels"
        # -------- pass A: 3x3/stride-1 conv1 as in-kernel shifted taps ------
        w1p = _pad_last(params["w1"], c_pad).reshape(9, c_in, c_pad)
        y1_t, st1 = _conv3x3_s1_stats(x.astype(jnp.bfloat16), w1p, tr,
                                      vmem_limit)
        mean1, var1 = _finish_stats(st1[:, 0, :], st1[:, 1, :], m)
        scale_s = jnp.ones((1, c_pad), jnp.float32)
        shift_s = jnp.zeros((1, c_pad), jnp.float32)
        y1_img = y1_t.reshape(n, ho, wo, c_pad)
        res = _pad_last(x, c_pad).astype(jnp.bfloat16)  # identity, bf16

    # ---- BN1 + ReLU, fused by XLA into the halo-window copy for conv2 ----
    scale1, shift1 = _bn_scale_shift(g1, be1, mean1, var1)
    h1 = jnp.maximum(
        y1_img.astype(jnp.float32) * scale1.reshape(1, 1, 1, -1)
        + shift1.reshape(1, 1, 1, -1), 0.0).astype(jnp.bfloat16)

    # -------- pass A (conv2): 3x3/stride-1 as in-kernel shifted taps --------
    w2p = jnp.zeros((3, 3, c_pad, c_pad), jnp.float32)
    w2p = w2p.at[:, :, :c_out, :c_out].set(params["w2"])
    y2_t, st2 = _conv3x3_s1_stats(h1, w2p.reshape(9, c_pad, c_pad), tr,
                                  vmem_limit)
    mean2, var2 = _finish_stats(st2[:, 0, :], st2[:, 1, :], m)
    scale2, shift2 = _bn_scale_shift(g2, be2, mean2, var2)

    # ---- pass B: BN2 + ReLU + shortcut-BN + residual add + final ReLU -----
    gcells, r_rows, _ = y2_t.shape
    res_t = res.reshape(gcells, r_rows, c_pad)          # layout matches y2_t
    out = _bn_apply_residual(y2_t, res_t, scale2, shift2, scale_s, shift_s,
                             vmem_limit)
    return out.reshape(n, ho, wo, c_pad)[..., :c_out]


# ---------------------------- pure-JAX reference ----------------------------
def ref_resblock(x, params, downsample):
    # Matches the kernel's core numerics: bf16 conv operands, f32 accumulation,
    # training-mode (biased) batch statistics.  Keeps the conv biases (the
    # kernels drop them because BN cancels them exactly).
    def conv(xx, wgt, b, stride, pad):
        y = lax.conv_general_dilated(
            xx.astype(jnp.bfloat16), wgt.astype(jnp.bfloat16),
            (stride, stride), [(pad, pad), (pad, pad)],
            dimension_numbers=("NHWC", "HWIO", "NHWC"),
            preferred_element_type=jnp.float32)
        return y + b.reshape(1, 1, 1, -1)

    def bn(xx, g, b):
        mean = jnp.mean(xx, axis=(0, 1, 2), keepdims=True)
        var = jnp.var(xx, axis=(0, 1, 2), keepdims=True)
        return ((xx - mean) * lax.rsqrt(var + BN_EPS)
                * g.reshape(1, 1, 1, -1) + b.reshape(1, 1, 1, -1))

    stride1 = 2 if downsample else 1
    if downsample:
        sc = bn(conv(x, params["ws"], params["bs"], 2, 0),
                params["bns_g"], params["bns_b"])
    else:
        sc = x
    hh = jax.nn.relu(bn(conv(x, params["w1"], params["b1"], stride1, 1),
                        params["bn1_g"], params["bn1_b"]))
    hh = jax.nn.relu(bn(conv(hh, params["w2"], params["b2"], 1, 1),
                        params["bn2_g"], params["bn2_b"]))
    return jax.nn.relu(hh + sc)


if __name__ == "__main__":
    key = jax.random.PRNGKey(0)
    kx1, kx2, kp1, kp2 = jax.random.split(key, 4)

    # bf16 intermediates (y1/y2/h1/residual) -> slightly looser tolerance than
    # a pure-f32 pipeline; any structural bug produces O(1) errors.
    ATOL = RTOL = 3e-2

    # Case 1: downsample=True (in=4 -> out=8); NHWC version of NCHW [2,4,16,16]
    x1 = jax.random.normal(kx1, (2, 16, 16, 4), jnp.float32)
    params1 = init_params(kp1, 4, 8, downsample=True)
    fwd1 = jax.jit(lambda xx, pp: resblock_forward(xx, pp, downsample=True))
    y1 = jax.block_until_ready(fwd1(x1, params1))
    r1 = ref_resblock(x1, params1, True)
    assert y1.shape == (2, 8, 8, 8)
    assert jnp.allclose(y1, r1, atol=ATOL, rtol=RTOL), \
        float(jnp.max(jnp.abs(y1 - r1)))

    # Case 2: downsample=False (identity shortcut, in=out=8)
    x2 = jax.random.normal(kx2, (2, 16, 16, 8), jnp.float32)
    params2 = init_params(kp2, 8, 8, downsample=False)
    fwd2 = jax.jit(lambda xx, pp: resblock_forward(xx, pp, downsample=False))
    y2 = jax.block_until_ready(fwd2(x2, params2))
    r2 = ref_resblock(x2, params2, False)
    assert y2.shape == (2, 16, 16, 8)
    assert jnp.allclose(y2, r2, atol=ATOL, rtol=RTOL), \
        float(jnp.max(jnp.abs(y2 - r2)))

    # Case 3: downsample with forced small tiles to exercise the multi-row-tile
    # halo windows (n_rt > 1) and the multi-tile patch-GEMM path (nt > 1).
    fwd3 = jax.jit(lambda xx, pp: resblock_forward(
        xx, pp, downsample=True, force_tr=4, force_tm=32))
    y3 = jax.block_until_ready(fwd3(x1, params1))
    assert y3.shape == (2, 8, 8, 8)
    assert jnp.allclose(y3, r1, atol=ATOL, rtol=RTOL), \
        float(jnp.max(jnp.abs(y3 - r1)))

    print("KERNEL_OK")
</pallas_src>

<mosaic_0001>
module attributes {stable_mosaic.version = 11 : i64} {
  func.func @_dsconv_kernel(%arg0: i32, %arg1: memref<128x36xbf16, #tpu.memory_space<vmem>>, %arg2: memref<128x4xbf16, #tpu.memory_space<vmem>>, %arg3: memref<36x128xbf16, #tpu.memory_space<vmem>>, %arg4: memref<4x128xbf16, #tpu.memory_space<vmem>>, %arg5: memref<128x128xbf16, #tpu.memory_space<vmem>>, %arg6: memref<128x128xbf16, #tpu.memory_space<vmem>>, %arg7: memref<1x4x128xf32, #tpu.memory_space<vmem>>) attributes {dimension_semantics = [#tpu.dimension_semantics<parallel>], iteration_bounds = array<i64: 1>, scalar_prefetch = 0 : i64, scratch_operands = 0 : i64, tpu.core_type = #tpu.core_type<tc>, window_params = [{transform_indices = @transform_0, window_bounds = array<i64: 128, 36>}, {transform_indices = @transform_1, window_bounds = array<i64: 128, 4>}, {pipeline_mode = #tpu.pipeline_mode<synchronous>, transform_indices = @transform_2, window_bounds = array<i64: 36, 128>}, {pipeline_mode = #tpu.pipeline_mode<synchronous>, transform_indices = @transform_3, window_bounds = array<i64: 4, 128>}, {transform_indices = @transform_4, window_bounds = array<i64: 128, 128>}, {transform_indices = @transform_5, window_bounds = array<i64: 128, 128>}, {transform_indices = @transform_6, window_bounds = array<i64: 1, 4, 128>}]} {
    %c0 = arith.constant 0 : index
    %c0_0 = arith.constant 0 : index
    %0 = vector.load %arg1[%c0, %c0_0] : memref<128x36xbf16, #tpu.memory_space<vmem>>, vector<128x36xbf16>
    %c0_1 = arith.constant 0 : index
    %c0_2 = arith.constant 0 : index
    %1 = vector.load %arg3[%c0_1, %c0_2] : memref<36x128xbf16, #tpu.memory_space<vmem>>, vector<36x128xbf16>
    %cst = arith.constant dense<0.000000e+00> : vector<128x128xf32>
    %2 = tpu.matmul %0, %1, %cst {dimension_numbers = #tpu.dot_dimension_numbers<[1], [0], [0], [1], [0, 0, 1, 1], [], []>} : vector<128x36xbf16>, vector<36x128xbf16>, vector<128x128xf32> -> vector<128x128xf32>
    %c0_3 = arith.constant 0 : index
    %c0_4 = arith.constant 0 : index
    %3 = vector.load %arg2[%c0_3, %c0_4] : memref<128x4xbf16, #tpu.memory_space<vmem>>, vector<128x4xbf16>
    %c0_5 = arith.constant 0 : index
    %c0_6 = arith.constant 0 : index
    %4 = vector.load %arg4[%c0_5, %c0_6] : memref<4x128xbf16, #tpu.memory_space<vmem>>, vector<4x128xbf16>
    %cst_7 = arith.constant dense<0.000000e+00> : vector<128x128xf32>
    %5 = tpu.matmul %3, %4, %cst_7 {dimension_numbers = #tpu.dot_dimension_numbers<[1], [0], [0], [1], [0, 0, 1, 1], [], []>} : vector<128x4xbf16>, vector<4x128xbf16>, vector<128x128xf32> -> vector<128x128xf32>
    %cst_8 = arith.constant dense<0.000000e+00> : vector<128xf32>
    %6 = vector.multi_reduction <add>, %2, %cst_8 [0] : vector<128x128xf32> to vector<128xf32>
    %7 = vector.shape_cast %6 : vector<128xf32> to vector<1x128xf32>
    %8 = arith.mulf %2, %2 : vector<128x128xf32>
    %cst_9 = arith.constant dense<0.000000e+00> : vector<128xf32>
    %9 = vector.multi_reduction <add>, %8, %cst_9 [0] : vector<128x128xf32> to vector<128xf32>
    %10 = vector.shape_cast %9 : vector<128xf32> to vector<1x128xf32>
    %cst_10 = arith.constant dense<0.000000e+00> : vector<128xf32>
    %11 = vector.multi_reduction <add>, %5, %cst_10 [0] : vector<128x128xf32> to vector<128xf32>
    %12 = vector.shape_cast %11 : vector<128xf32> to vector<1x128xf32>
    %13 = arith.mulf %5, %5 : vector<128x128xf32>
    %cst_11 = arith.constant dense<0.000000e+00> : vector<128xf32>
    %14 = vector.multi_reduction <add>, %13, %cst_11 [0] : vector<128x128xf32> to vector<128xf32>
    %15 = vector.shape_cast %14 : vector<128xf32> to vector<1x128xf32>
    %16 = tpu.concatenate %7, %10, %12, %15 in 0 : vector<1x128xf32>, vector<1x128xf32>, vector<1x128xf32>, vector<1x128xf32> -> vector<4x128xf32>
    %c0_12 = arith.constant 0 : index
    %c0_13 = arith.constant 0 : index
    %c0_14 = arith.constant 0 : index
    %17 = vector.load %arg7[%c0_12, %c0_13, %c0_14] : memref<1x4x128xf32, #tpu.memory_space<vmem>>, vector<1x4x128xf32>
    %18 = vector.shape_cast %17 : vector<1x4x128xf32> to vector<4x128xf32>
    %19 = vector.shape_cast %16 : vector<4x128xf32> to vector<1x4x128xf32>
    tpu.vector_store %arg7[%c0_12, %c0_13, %c0_14], %19 {strides = array<i32>} : memref<1x4x128xf32, #tpu.memory_space<vmem>>, vector<1x4x128xf32>,
    %20 = arith.truncf %2 : vector<128x128xf32> to vector<128x128xbf16>
    %c0_15 = arith.constant 0 : index
    %c0_16 = arith.constant 0 : index
    %21 = vector.load %arg5[%c0_15, %c0_16] : memref<128x128xbf16, #tpu.memory_space<vmem>>, vector<128x128xbf16>
    tpu.vector_store %arg5[%c0_15, %c0_16], %20 {strides = array<i32>} : memref<128x128xbf16, #tpu.memory_space<vmem>>, vector<128x128xbf16>,
    %22 = arith.truncf %5 : vector<128x128xf32> to vector<128x128xbf16>
    %c0_17 = arith.constant 0 : index
    %c0_18 = arith.constant 0 : index
    %23 = vector.load %arg6[%c0_17, %c0_18] : memref<128x128xbf16, #tpu.memory_space<vmem>>, vector<128x128xbf16>
    tpu.vector_store %arg6[%c0_17, %c0_18], %22 {strides = array<i32>} : memref<128x128xbf16, #tpu.memory_space<vmem>>, vector<128x128xbf16>,
    return
  }
  func.func @transform_0(%arg0: i32) -> (i32, i32) {
    %c0_i32 = arith.constant 0 : i32
    %c0_i32_0 = arith.constant 0 : i32
    return %arg0, %c0_i32 : i32, i32
  }
  func.func @transform_1(%arg0: i32) -> (i32, i32) {
    %c0_i32 = arith.constant 0 : i32
    %c0_i32_0 = arith.constant 0 : i32
    return %arg0, %c0_i32 : i32, i32
  }
  func.func @transform_2(%arg0: i32) -> (i32, i32) {
    %c0_i32 = arith.constant 0 : i32
    %c0_i32_0 = arith.constant 0 : i32
    %c0_i32_1 = arith.constant 0 : i32
    return %c0_i32, %c0_i32_0 : i32, i32
  }
  func.func @transform_3(%arg0: i32) -> (i32, i32) {
    %c0_i32 = arith.constant 0 : i32
    %c0_i32_0 = arith.constant 0 : i32
    %c0_i32_1 = arith.constant 0 : i32
    return %c0_i32, %c0_i32_0 : i32, i32
  }
  func.func @transform_4(%arg0: i32) -> (i32, i32) {
    %c0_i32 = arith.constant 0 : i32
    %c0_i32_0 = arith.constant 0 : i32
    return %arg0, %c0_i32 : i32, i32
  }
  func.func @transform_5(%arg0: i32) -> (i32, i32) {
    %c0_i32 = arith.constant 0 : i32
    %c0_i32_0 = arith.constant 0 : i32
    return %arg0, %c0_i32 : i32, i32
  }
  func.func @transform_6(%arg0: i32) -> (i32, i32, i32) {
    %c0_i32 = arith.constant 0 : i32
    %c0_i32_0 = arith.constant 0 : i32
    %c0_i32_1 = arith.constant 0 : i32
    return %arg0, %c0_i32, %c0_i32_0 : i32, i32, i32
  }
}

module attributes {stable_mosaic.version = 11 : i64} {
  func.func @kernel(%arg0: i32, %arg1: memref<1x10x10x128xbf16, #tpu.memory_space<vmem>>, %arg2: memref<9x128x128xbf16, #tpu.memory_space<vmem>>, %arg3: memref<1x64x128xbf16, #tpu.memory_space<vmem>>, %arg4: memref<1x2x128xf32, #tpu.memory_space<vmem>>) attributes {dimension_semantics = [#tpu.dimension_semantics<parallel>], iteration_bounds = array<i64: 2>, scalar_prefetch = 0 : i64, scratch_operands = 0 : i64, tpu.core_type = #tpu.core_type<tc>, window_params = [{transform_indices = @transform_0, window_bounds = array<i64: 1, 10, 10, 128>}, {pipeline_mode = #tpu.pipeline_mode<synchronous>, transform_indices = @transform_1, window_bounds = array<i64: 9, 128, 128>}, {transform_indices = @transform_2, window_bounds = array<i64: 1, 64, 128>}, {transform_indices = @transform_3, window_bounds = array<i64: 1, 2, 128>}]} {
    %c0 = arith.constant 0 : index
    %c0_0 = arith.constant 0 : index
    %c0_1 = arith.constant 0 : index
    %c0_2 = arith.constant 0 : index
    %0 = vector.load %arg1[%c0, %c0_0, %c0_1, %c0_2] : memref<1x10x10x128xbf16, #tpu.memory_space<vmem>>, vector<1x10x10x128xbf16>
    %1 = vector.shape_cast %0 : vector<1x10x10x128xbf16> to vector<10x10x128xbf16>
    %2 = vector.extract_strided_slice %1 {offsets = [0, 0, 0], sizes = [8, 8, 128], strides = [1, 1, 1]} : vector<10x10x128xbf16> to vector<8x8x128xbf16>
    %3 = vector.shape_cast %2 : vector<8x8x128xbf16> to vector<64x128xbf16>
    %c0_3 = arith.constant 0 : index
    %c0_4 = arith.constant 0 : index
    %c0_5 = arith.constant 0 : index
    %4 = vector.load %arg2[%c0_3, %c0_4, %c0_5] : memref<9x128x128xbf16, #tpu.memory_space<vmem>>, vector<1x128x128xbf16>
    %5 = vector.shape_cast %4 : vector<1x128x128xbf16> to vector<128x128xbf16>
    %cst = arith.constant dense<0.000000e+00> : vector<64x128xf32>
    %6 = tpu.matmul %3, %5, %cst {dimension_numbers = #tpu.dot_dimension_numbers<[1], [0], [0], [1], [0, 0, 1, 1], [], []>} : vector<64x128xbf16>, vector<128x128xbf16>, vector<64x128xf32> -> vector<64x128xf32>
    %7 = vector.extract_strided_slice %1 {offsets = [0, 1, 0], sizes = [8, 8, 128], strides = [1, 1, 1]} : vector<10x10x128xbf16> to vector<8x8x128xbf16>
    %8 = vector.shape_cast %7 : vector<8x8x128xbf16> to vector<64x128xbf16>
    %c1 = arith.constant 1 : index
    %c0_6 = arith.constant 0 : index
    %c0_7 = arith.constant 0 : index
    %9 = vector.load %arg2[%c1, %c0_6, %c0_7] : memref<9x128x128xbf16, #tpu.memory_space<vmem>>, vector<1x128x128xbf16>
    %10 = vector.shape_cast %9 : vector<1x128x128xbf16> to vector<128x128xbf16>
    %cst_8 = arith.constant dense<0.000000e+00> : vector<64x128xf32>
    %11 = tpu.matmul %8, %10, %cst_8 {dimension_numbers = #tpu.dot_dimension_numbers<[1], [0], [0], [1], [0, 0, 1, 1], [], []>} : vector<64x128xbf16>, vector<128x128xbf16>, vector<64x128xf32> -> vector<64x128xf32>
    %12 = arith.addf %6, %11 : vector<64x128xf32>
    %13 = vector.extract_strided_slice %1 {offsets = [0, 2, 0], sizes = [8, 8, 128], strides = [1, 1, 1]} : vector<10x10x128xbf16> to vector<8x8x128xbf16>
    %14 = vector.shape_cast %13 : vector<8x8x128xbf16> to vector<64x128xbf16>
    %c2 = arith.constant 2 : index
    %c0_9 = arith.constant 0 : index
    %c0_10 = arith.constant 0 : index
    %15 = vector.load %arg2[%c2, %c0_9, %c0_10] : memref<9x128x128xbf16, #tpu.memory_space<vmem>>, vector<1x128x128xbf16>
    %16 = vector.shape_cast %15 : vector<1x128x128xbf16> to vector<128x128xbf16>
    %cst_11 = arith.constant dense<0.000000e+00> : vector<64x128xf32>
    %17 = tpu.matmul %14, %16, %cst_11 {dimension_numbers = #tpu.dot_dimension_numbers<[1], [0], [0], [1], [0, 0, 1, 1], [], []>} : vector<64x128xbf16>, vector<128x128xbf16>, vector<64x128xf32> -> vector<64x128xf32>
    %18 = arith.addf %12, %17 : vector<64x128xf32>
    %19 = vector.extract_strided_slice %1 {offsets = [1, 0, 0], sizes = [8, 8, 128], strides = [1, 1, 1]} : vector<10x10x128xbf16> to vector<8x8x128xbf16>
    %20 = vector.shape_cast %19 : vector<8x8x128xbf16> to vector<64x128xbf16>
    %c3 = arith.constant 3 : index
    %c0_12 = arith.constant 0 : index
    %c0_13 = arith.constant 0 : index
    %21 = vector.load %arg2[%c3, %c0_12, %c0_13] : memref<9x128x128xbf16, #tpu.memory_space<vmem>>, vector<1x128x128xbf16>
    %22 = vector.shape_cast %21 : vector<1x128x128xbf16> to vector<128x128xbf16>
    %cst_14 = arith.constant dense<0.000000e+00> : vector<64x128xf32>
    %23 = tpu.matmul %20, %22, %cst_14 {dimension_numbers = #tpu.dot_dimension_numbers<[1], [0], [0], [1], [0, 0, 1, 1], [], []>} : vector<64x128xbf16>, vector<128x128xbf16>, vector<64x128xf32> -> vector<64x128xf32>
    %24 = arith.addf %18, %23 : vector<64x128xf32>
    %25 = vector.extract_strided_slice %1 {offsets = [1, 1, 0], sizes = [8, 8, 128], strides = [1, 1, 1]} : vector<10x10x128xbf16> to vector<8x8x128xbf16>
    %26 = vector.shape_cast %25 : vector<8x8x128xbf16> to vector<64x128xbf16>
    %c4 = arith.constant 4 : index
    %c0_15 = arith.constant 0 : index
    %c0_16 = arith.constant 0 : index
    %27 = vector.load %arg2[%c4, %c0_15, %c0_16] : memref<9x128x128xbf16, #tpu.memory_space<vmem>>, vector<1x128x128xbf16>
    %28 = vector.shape_cast %27 : vector<1x128x128xbf16> to vector<128x128xbf16>
    %cst_17 = arith.constant dense<0.000000e+00> : vector<64x128xf32>
    %29 = tpu.matmul %26, %28, %cst_17 {dimension_numbers = #tpu.dot_dimension_numbers<[1], [0], [0], [1], [0, 0, 1, 1], [], []>} : vector<64x128xbf16>, vector<128x128xbf16>, vector<64x128xf32> -> vector<64x128xf32>
    %30 = arith.addf %24, %29 : vector<64x128xf32>
    %31 = vector.extract_strided_slice %1 {offsets = [1, 2, 0], sizes = [8, 8, 128], strides = [1, 1, 1]} : vector<10x10x128xbf16> to vector<8x8x128xbf16>
    %32 = vector.shape_cast %31 : vector<8x8x128xbf16> to vector<64x128xbf16>
    %c5 = arith.constant 5 : index
    %c0_18 = arith.constant 0 : index
    %c0_19 = arith.constant 0 : index
    %33 = vector.load %arg2[%c5, %c0_18, %c0_19] : memref<9x128x128xbf16, #tpu.memory_space<vmem>>, vector<1x128x128xbf16>
    %34 = vector.shape_cast %33 : vector<1x128x128xbf16> to vector<128x128xbf16>
    %cst_20 = arith.constant dense<0.000000e+00> : vector<64x128xf32>
    %35 = tpu.matmul %32, %34, %cst_20 {dimension_numbers = #tpu.dot_dimension_numbers<[1], [0], [0], [1], [0, 0, 1, 1], [], []>} : vector<64x128xbf16>, vector<128x128xbf16>, vector<64x128xf32> -> vector<64x128xf32>
    %36 = arith.addf %30, %35 : vector<64x128xf32>
    %37 = vector.extract_strided_slice %1 {offsets = [2, 0, 0], sizes = [8, 8, 128], strides = [1, 1, 1]} : vector<10x10x128xbf16> to vector<8x8x128xbf16>
    %38 = vector.shape_cast %37 : vector<8x8x128xbf16> to vector<64x128xbf16>
    %c6 = arith.constant 6 : index
    %c0_21 = arith.constant 0 : index
    %c0_22 = arith.constant 0 : index
    %39 = vector.load %arg2[%c6, %c0_21, %c0_22] : memref<9x128x128xbf16, #tpu.memory_space<vmem>>, vector<1x128x128xbf16>
    %40 = vector.shape_cast %39 : vector<1x128x128xbf16> to vector<128x128xbf16>
    %cst_23 = arith.constant dense<0.000000e+00> : vector<64x128xf32>
    %41 = tpu.matmul %38, %40, %cst_23 {dimension_numbers = #tpu.dot_dimension_numbers<[1], [0], [0], [1], [0, 0, 1, 1], [], []>} : vector<64x128xbf16>, vector<128x128xbf16>, vector<64x128xf32> -> vector<64x128xf32>
    %42 = arith.addf %36, %41 : vector<64x128xf32>
    %43 = vector.extract_strided_slice %1 {offsets = [2, 1, 0], sizes = [8, 8, 128], strides = [1, 1, 1]} : vector<10x10x128xbf16> to vector<8x8x128xbf16>
    %44 = vector.shape_cast %43 : vector<8x8x128xbf16> to vector<64x128xbf16>
    %c7 = arith.constant 7 : index
    %c0_24 = arith.constant 0 : index
    %c0_25 = arith.constant 0 : index
    %45 = vector.load %arg2[%c7, %c0_24, %c0_25] : memref<9x128x128xbf16, #tpu.memory_space<vmem>>, vector<1x128x128xbf16>
    %46 = vector.shape_cast %45 : vector<1x128x128xbf16> to vector<128x128xbf16>
    %cst_26 = arith.constant dense<0.000000e+00> : vector<64x128xf32>
    %47 = tpu.matmul %44, %46, %cst_26 {dimension_numbers = #tpu.dot_dimension_numbers<[1], [0], [0], [1], [0, 0, 1, 1], [], []>} : vector<64x128xbf16>, vector<128x128xbf16>, vector<64x128xf32> -> vector<64x128xf32>
    %48 = arith.addf %42, %47 : vector<64x128xf32>
    %49 = vector.extract_strided_slice %1 {offsets = [2, 2, 0], sizes = [8, 8, 128], strides = [1, 1, 1]} : vector<10x10x128xbf16> to vector<8x8x128xbf16>
    %50 = vector.shape_cast %49 : vector<8x8x128xbf16> to vector<64x128xbf16>
    %c8 = arith.constant 8 : index
    %c0_27 = arith.constant 0 : index
    %c0_28 = arith.constant 0 : index
    %51 = vector.load %arg2[%c8, %c0_27, %c0_28] : memref<9x128x128xbf16, #tpu.memory_space<vmem>>, vector<1x128x128xbf16>
    %52 = vector.shape_cast %51 : vector<1x128x128xbf16> to vector<128x128xbf16>
    %cst_29 = arith.constant dense<0.000000e+00> : vector<64x128xf32>
    %53 = tpu.matmul %50, %52, %cst_29 {dimension_numbers = #tpu.dot_dimension_numbers<[1], [0], [0], [1], [0, 0, 1, 1], [], []>} : vector<64x128xbf16>, vector<128x128xbf16>, vector<64x128xf32> -> vector<64x128xf32>
    %54 = arith.addf %48, %53 : vector<64x128xf32>
    %cst_30 = arith.constant dense<0.000000e+00> : vector<128xf32>
    %55 = vector.multi_reduction <add>, %54, %cst_30 [0] : vector<64x128xf32> to vector<128xf32>
    %56 = vector.shape_cast %55 : vector<128xf32> to vector<1x128xf32>
    %57 = arith.mulf %54, %54 : vector<64x128xf32>
    %cst_31 = arith.constant dense<0.000000e+00> : vector<128xf32>
    %58 = vector.multi_reduction <add>, %57, %cst_31 [0] : vector<64x128xf32> to vector<128xf32>
    %59 = vector.shape_cast %58 : vector<128xf32> to vector<1x128xf32>
    %60 = tpu.concatenate %56, %59 in 0 : vector<1x128xf32>, vector<1x128xf32> -> vector<2x128xf32>
    %c0_32 = arith.constant 0 : index
    %c0_33 = arith.constant 0 : index
    %c0_34 = arith.constant 0 : index
    %61 = vector.load %arg4[%c0_32, %c0_33, %c0_34] : memref<1x2x128xf32, #tpu.memory_space<vmem>>, vector<1x2x128xf32>
    %62 = vector.shape_cast %61 : vector<1x2x128xf32> to vector<2x128xf32>
    %63 = vector.shape_cast %60 : vector<2x128xf32> to vector<1x2x128xf32>
    tpu.vector_store %arg4[%c0_32, %c0_33, %c0_34], %63 {strides = array<i32>} : memref<1x2x128xf32, #tpu.memory_space<vmem>>, vector<1x2x128xf32>,
    %64 = arith.truncf %54 : vector<64x128xf32> to vector<64x128xbf16>
    %c0_35 = arith.constant 0 : index
    %c0_36 = arith.constant 0 : index
    %c0_37 = arith.constant 0 : index
    %65 = vector.load %arg3[%c0_35, %c0_36, %c0_37] : memref<1x64x128xbf16, #tpu.memory_space<vmem>>, vector<1x64x128xbf16>
    %66 = vector.shape_cast %65 : vector<1x64x128xbf16> to vector<64x128xbf16>
    %67 = vector.shape_cast %64 : vector<64x128xbf16> to vector<1x64x128xbf16>
    tpu.vector_store %arg3[%c0_35, %c0_36, %c0_37], %67 {strides = array<i32>} : memref<1x64x128xbf16, #tpu.memory_space<vmem>>, vector<1x64x128xbf16>,
    return
  }
  func.func @transform_0(%arg0: i32) -> (i32, i32, i32, i32) {
    %c0_i32 = arith.constant 0 : i32
    %c0_i32_0 = arith.constant 0 : i32
    %c0_i32_1 = arith.constant 0 : i32
    %c0_i32_2 = arith.constant 0 : i32
    return %arg0, %c0_i32, %c0_i32_0, %c0_i32_1 : i32, i32, i32, i32
  }
  func.func @transform_1(%arg0: i32) -> (i32, i32, i32) {
    %c0_i32 = arith.constant 0 : i32
    %c0_i32_0 = arith.constant 0 : i32
    %c0_i32_1 = arith.constant 0 : i32
    %c0_i32_2 = arith.constant 0 : i32
    return %c0_i32, %c0_i32_0, %c0_i32_1 : i32, i32, i32
  }
  func.func @transform_2(%arg0: i32) -> (i32, i32, i32) {
    %c0_i32 = arith.constant 0 : i32
    %c0_i32_0 = arith.constant 0 : i32
    %c0_i32_1 = arith.constant 0 : i32
    return %arg0, %c0_i32, %c0_i32_0 : i32, i32, i32
  }
  func.func @transform_3(%arg0: i32) -> (i32, i32, i32) {
    %c0_i32 = arith.constant 0 : i32
    %c0_i32_0 = arith.constant 0 : i32
    %c0_i32_1 = arith.constant 0 : i32
    return %arg0, %c0_i32, %c0_i32_0 : i32, i32, i32
  }
}

module attributes {stable_mosaic.version = 11 : i64} {
  func.func @_apply_res_kernel(%arg0: i32, %arg1: memref<1x64x128xbf16, #tpu.memory_space<vmem>>, %arg2: memref<1x64x128xbf16, #tpu.memory_space<vmem>>, %arg3: memref<1x128xf32, #tpu.memory_space<vmem>>, %arg4: memref<1x128xf32, #tpu.memory_space<vmem>>, %arg5: memref<1x128xf32, #tpu.memory_space<vmem>>, %arg6: memref<1x128xf32, #tpu.memory_space<vmem>>, %arg7: memref<1x64x128xf32, #tpu.memory_space<vmem>>) attributes {dimension_semantics = [#tpu.dimension_semantics<parallel>], iteration_bounds = array<i64: 2>, scalar_prefetch = 0 : i64, scratch_operands = 0 : i64, tpu.core_type = #tpu.core_type<tc>, window_params = [{transform_indices = @transform_0, window_bounds = array<i64: 1, 64, 128>}, {transform_indices = @transform_1, window_bounds = array<i64: 1, 64, 128>}, {pipeline_mode = #tpu.pipeline_mode<synchronous>, transform_indices = @transform_2, window_bounds = array<i64: 1, 128>}, {pipeline_mode = #tpu.pipeline_mode<synchronous>, transform_indices = @transform_3, window_bounds = array<i64: 1, 128>}, {pipeline_mode = #tpu.pipeline_mode<synchronous>, transform_indices = @transform_4, window_bounds = array<i64: 1, 128>}, {pipeline_mode = #tpu.pipeline_mode<synchronous>, transform_indices = @transform_5, window_bounds = array<i64: 1, 128>}, {transform_indices = @transform_6, window_bounds = array<i64: 1, 64, 128>}]} {
    %c0 = arith.constant 0 : index
    %c0_0 = arith.constant 0 : index
    %c0_1 = arith.constant 0 : index
    %0 = vector.load %arg1[%c0, %c0_0, %c0_1] : memref<1x64x128xbf16, #tpu.memory_space<vmem>>, vector<1x64x128xbf16>
    %1 = vector.shape_cast %0 : vector<1x64x128xbf16> to vector<64x128xbf16>
    %2 = arith.extf %1 : vector<64x128xbf16> to vector<64x128xf32>
    %c0_2 = arith.constant 0 : index
    %c0_3 = arith.constant 0 : index
    %3 = vector.load %arg3[%c0_2, %c0_3] : memref<1x128xf32, #tpu.memory_space<vmem>>, vector<1x128xf32>
    %4 = vector.broadcast %3 : vector<1x128xf32> to vector<64x128xf32>
    %5 = arith.mulf %2, %4 : vector<64x128xf32>
    %c0_4 = arith.constant 0 : index
    %c0_5 = arith.constant 0 : index
    %6 = vector.load %arg4[%c0_4, %c0_5] : memref<1x128xf32, #tpu.memory_space<vmem>>, vector<1x128xf32>
    %7 = vector.broadcast %6 : vector<1x128xf32> to vector<64x128xf32>
    %8 = arith.addf %5, %7 : vector<64x128xf32>
    %cst = arith.constant 0.000000e+00 : f32
    %9 = vector.broadcast %cst : f32 to vector<64x128xf32>
    %10 = arith.maximumf %8, %9 : vector<64x128xf32>
    %c0_6 = arith.constant 0 : index
    %c0_7 = arith.constant 0 : index
    %c0_8 = arith.constant 0 : index
    %11 = vector.load %arg2[%c0_6, %c0_7, %c0_8] : memref<1x64x128xbf16, #tpu.memory_space<vmem>>, vector<1x64x128xbf16>
    %12 = vector.shape_cast %11 : vector<1x64x128xbf16> to vector<64x128xbf16>
    %13 = arith.extf %12 : vector<64x128xbf16> to vector<64x128xf32>
    %c0_9 = arith.constant 0 : index
    %c0_10 = arith.constant 0 : index
    %14 = vector.load %arg5[%c0_9, %c0_10] : memref<1x128xf32, #tpu.memory_space<vmem>>, vector<1x128xf32>
    %15 = vector.broadcast %14 : vector<1x128xf32> to vector<64x128xf32>
    %16 = arith.mulf %13, %15 : vector<64x128xf32>
    %c0_11 = arith.constant 0 : index
    %c0_12 = arith.constant 0 : index
    %17 = vector.load %arg6[%c0_11, %c0_12] : memref<1x128xf32, #tpu.memory_space<vmem>>, vector<1x128xf32>
    %18 = vector.broadcast %17 : vector<1x128xf32> to vector<64x128xf32>
    %19 = arith.addf %16, %18 : vector<64x128xf32>
    %20 = arith.addf %10, %19 : vector<64x128xf32>
    %cst_13 = arith.constant 0.000000e+00 : f32
    %21 = vector.broadcast %cst_13 : f32 to vector<64x128xf32>
    %22 = arith.maximumf %20, %21 : vector<64x128xf32>
    %c0_14 = arith.constant 0 : index
    %c0_15 = arith.constant 0 : index
    %c0_16 = arith.constant 0 : index
    %23 = vector.load %arg7[%c0_14, %c0_15, %c0_16] : memref<1x64x128xf32, #tpu.memory_space<vmem>>, vector<1x64x128xf32>
    %24 = vector.shape_cast %23 : vector<1x64x128xf32> to vector<64x128xf32>
    %25 = vector.shape_cast %22 : vector<64x128xf32> to vector<1x64x128xf32>
    tpu.vector_store %arg7[%c0_14, %c0_15, %c0_16], %25 {strides = array<i32>} : memref<1x64x128xf32, #tpu.memory_space<vmem>>, vector<1x64x128xf32>,
    return
  }
  func.func @transform_0(%arg0: i32) -> (i32, i32, i32) {
    %c0_i32 = arith.constant 0 : i32
    %c0_i32_0 = arith.constant 0 : i32
    %c0_i32_1 = arith.constant 0 : i32
    return %arg0, %c0_i32, %c0_i32_0 : i32, i32, i32
  }
  func.func @transform_1(%arg0: i32) -> (i32, i32, i32) {
    %c0_i32 = arith.constant 0 : i32
    %c0_i32_0 = arith.constant 0 : i32
    %c0_i32_1 = arith.constant 0 : i32
    return %arg0, %c0_i32, %c0_i32_0 : i32, i32, i32
  }
  func.func @transform_2(%arg0: i32) -> (i32, i32) {
    %c0_i32 = arith.constant 0 : i32
    %c0_i32_0 = arith.constant 0 : i32
    %c0_i32_1 = arith.constant 0 : i32
    return %c0_i32, %c0_i32_0 : i32, i32
  }
  func.func @transform_3(%arg0: i32) -> (i32, i32) {
    %c0_i32 = arith.constant 0 : i32
    %c0_i32_0 = arith.constant 0 : i32
    %c0_i32_1 = arith.constant 0 : i32
    return %c0_i32, %c0_i32_0 : i32, i32
  }
  func.func @transform_4(%arg0: i32) -> (i32, i32) {
    %c0_i32 = arith.constant 0 : i32
    %c0_i32_0 = arith.constant 0 : i32
    %c0_i32_1 = arith.constant 0 : i32
    return %c0_i32, %c0_i32_0 : i32, i32
  }
  func.func @transform_5(%arg0: i32) -> (i32, i32) {
    %c0_i32 = arith.constant 0 : i32
    %c0_i32_0 = arith.constant 0 : i32
    %c0_i32_1 = arith.constant 0 : i32
    return %c0_i32, %c0_i32_0 : i32, i32
  }
  func.func @transform_6(%arg0: i32) -> (i32, i32, i32) {
    %c0_i32 = arith.constant 0 : i32
    %c0_i32_0 = arith.constant 0 : i32
    %c0_i32_1 = arith.constant 0 : i32
    return %arg0, %c0_i32, %c0_i32_0 : i32, i32, i32
  }
}

</mosaic_0001>

<bundles_post_ra>
// kernel: _lambda_.3
= control target key start
LH: loop header
LB: loop body
LE: loop exit
PB: predicated region body
PF: predicated region fallthrough
CT: control target
= control target key end

     0   :  { %vm122_vm0 = vcmask 1041408   ;;  %vm232_vm1 = vcmask 31744   ;;  %vm97_vm2 = vcmask 293888   ;;  %vm425_vm3 = vcmask 1040384   ;;  %s948_s3 = inlined_call_operand.vmem [shape: bf16[4,128], index: 3, kind: input, shape index: {}]   ;;  %s949_s1 = inlined_call_operand.vmem [shape: bf16[128,4], index: 1, kind: input, shape index: {}]   ;;  %s950_s2 = inlined_call_operand.vmem [shape: bf16[36,128], index: 2, kind: input, shape index: {}]   ;;  %s951_s0 = inlined_call_operand.vmem [shape: bf16[128,36], index: 0, kind: input, shape index: {}]   ;;  %s952_s5 = inlined_call_operand.vmem [shape: bf16[128,128], index: 5, kind: output, shape index: {1}]   ;;  %s953_s4 = inlined_call_operand.vmem [shape: bf16[128,128], index: 4, kind: output, shape index: {0}]   ;;  %s954_s6 = inlined_call_operand.vmem [shape: f32[1,4,128], index: 6, kind: output, shape index: {2}]  }
   0x1   :  { %v191_v0 = vld [vmem:[%s948_s3] sm:$0x3]  ;;  %v41_v1 = vld [vmem:[%s950_s2 + $0x10] sm:$0x3]  ;;  %v610_v6 = vld [vmem:[%s949_s1 + $0x28] sm:$0xff]  ;;  %vm428_vm4 = vcmask 1042432  }
   0x2   :  { %v258_v2 = vsel %vm122_vm0, %v191_v0, 0  ;;  %v605_v3 = vld [vmem:[%s949_s1] sm:$0xff]  ;;  %v91_v4 = vunpack.c.l.b16 %v41_v1  ;;  %v604_v8 = vld [vmem:[%s950_s2 + $0x8] sm:$0xff]  ;;  %v611_v13 = vld [vmem:[%s949_s1 + $0x30] sm:$0xff] }
   0x3   :  { %267 = vmatpush.bf16.msra.mxu1 %v258_v2  ;;  %710 = vmatpush.bf16.msra.mxu3 %v258_v2  ;;  %v603_v9 = vld [vmem:[%s950_s2] sm:$0xff]  ;;  %v606_v12 = vld [vmem:[%s949_s1 + $0x8] sm:$0xff]  ;;  %v607_v16 = vld [vmem:[%s949_s1 + $0x10] sm:$0xff] }
   0x4   :  { %v94_v5 = vpack.c.b16 %v91_v4, %v91_v4  ;;  %v595_v10 = vld [vmem:[%s951_s0] sm:$0xff]  ;;  %v596_v14 = vld [vmem:[%s951_s0 + $0x8] sm:$0xff]  ;;  %v612_v17 = vld [vmem:[%s949_s1 + $0x38] sm:$0xff] }
   0x5   :  { %v599_v11 = vld [vmem:[%s951_s0 + $0x20] sm:$0xff]  ;;  %v600_v15 = vld [vmem:[%s951_s0 + $0x28] sm:$0xff]  ;;  %v597_v18 = vld [vmem:[%s951_s0 + $0x10] sm:$0xff] }
   0x6   :  { %587 = vmatmul.msk.bf16.vlgmr.msra.gmra.mxu1 %vm232_vm1, %v605_v3  ;;  %v124_v7 = vsel %vm122_vm0, %v94_v5, 0  ;;  %592 = vmatmul.msk.bf16.vlgmr.msra.gmra.mxu3 %vm232_vm1, %v610_v6  ;;  %v601_v19 = vld [vmem:[%s951_s0 + $0x30] sm:$0xff]  ;;  %v608_v20 = vld [vmem:[%s949_s1 + $0x18] sm:$0xff]  ;;  %v609_v23 = vld [vmem:[%s949_s1 + $0x20] sm:$0xff] }
   0x7   :  { %131 = vmatpush.bf16.msra.mxu0 %v124_v7  ;;  %707 = vmatpush.bf16.msra.mxu2 %v124_v7  ;;  %v598_v21 = vld [vmem:[%s951_s0 + $0x18] sm:$0xff] }
   0x8   :  { %v602_v22 = vld [vmem:[%s951_s0 + $0x38] sm:$0xff] }
   0xb   :  { %132 = vmatpush.bf16.msra.mxu0 %v604_v8  ;;  %708 = vmatpush.bf16.msra.mxu2 %v604_v8 }
   0xf   :  { %133 = vmatpush.bf16.msra.mxu0 %v603_v9  ;;  %709 = vmatpush.bf16.msra.mxu2 %v603_v9 }
  0x12   :  { %547 = vmatmul.msk.bf16.vlgmr.msra.gmra.mxu0 %vm97_vm2, %v595_v10  ;;  %551 = vmatmul.msk.bf16.vlgmr.msra.gmra.mxu2 %vm97_vm2, %v599_v11 }
  0x16   :  { %588 = vmatmul.msk.bf16.gmra.mxu1 %vm232_vm1, %v606_v12  ;;  %593 = vmatmul.msk.bf16.gmra.mxu3 %vm232_vm1, %v611_v13 }
  0x22   :  { %548 = vmatmul.msk.bf16.gmra.mxu0 %vm97_vm2, %v596_v14  ;;  %552 = vmatmul.msk.bf16.gmra.mxu2 %vm97_vm2, %v600_v15 }
  0x26   :  { %589 = vmatmul.msk.bf16.gmra.mxu1 %vm232_vm1, %v607_v16  ;;  %594 = vmatmul.msk.bf16.gmra.mxu3 %vm232_vm1, %v612_v17 }
  0x32   :  { %549 = vmatmul.msk.bf16.gmra.mxu0 %vm97_vm2, %v597_v18  ;;  %553 = vmatmul.msk.bf16.gmra.mxu2 %vm97_vm2, %v601_v19 }
  0x36   :  { %590 = vmatmul.msk.bf16.gmra.mxu1 %vm232_vm1, %v608_v20 }
  0x42   :  { %550 = vmatmul.msk.bf16.gmra.mxu0 %vm97_vm2, %v598_v21  ;;  %554 = vmatmul.msk.bf16.gmra.mxu2 %vm97_vm2, %v602_v22 }
  0x46   :  { %591 = vmatmul.msk.bf16.gmra.mxu1 %vm232_vm1, %v609_v23 }
  0x83   :  { %v269_v24 = vpop.f32.mrf.mxu1 }
  0x84   :  { %v388_v61 = vmul.f32 %v269_v24, %v269_v24 }
  0x89   :  { %v824_v25 = vpop.f32.mrf.mxu3 }
  0x8b   :  { %v271_v26 = vpop.f32.mrf.mxu1 }
  0x8c   :  { %v656_v27 = vpack.c.bf16 %v271_v26, %v269_v24  ;;  %v389_v59 = vmul.f32 %v271_v26, %v271_v26  ;;  %v367_v62 = vadd.f32 %v271_v26, %v269_v24 }
  0x8e   :  { %657 = vst [vmem:[%s952_s5] sm:$0xff] %v656_v27   ;;  %v404_v5 = vadd.f32 %v389_v59, %v388_v61 }
  0x8f   :  { %v135_v28 = vpop.f32.mrf.mxu0 }
  0x90   :  { %v330_v1 = vmul.f32 %v135_v28, %v135_v28 }
  0x91   :  { %v829_v29 = vpop.f32.mrf.mxu3 }
  0x92   :  { %v681_v30 = vpack.c.bf16 %v829_v29, %v824_v25 }
  0x93   :  { %v274_v31 = vpop.f32.mrf.mxu1 }
  0x94   :  { %704 = vst [vmem:[%s952_s5 + $0x28] sm:$0xff] %v681_v30   ;;  %v390_v63 = vmul.f32 %v274_v31, %v274_v31  ;;  %v368_v6 = vadd.f32 %v367_v62, %v274_v31 }
  0x95   :  { %v836_v32 = vpop.f32.mrf.mxu2 }
  0x96   :  { %v405_v13 = vadd.f32 %v404_v5, %v390_v63  ;;  %v338_v61 = vmul.f32 %v836_v32, %v836_v32 }
  0x97   :  { %v137_v33 = vpop.f32.mrf.mxu0 }
  0x98   :  { %v616_v34 = vpack.c.bf16 %v137_v33, %v135_v28  ;;  %v331_v60 = vmul.f32 %v137_v33, %v137_v33  ;;  %v309_v2 = vadd.f32 %v137_v33, %v135_v28 }
  0x99   :  { %v838_v35 = vpop.f32.mrf.mxu3 }
  0x9a   :  { %617 = vst [vmem:[%s953_s4] sm:$0xff] %v616_v34   ;;  %v346_v9 = vadd.f32 %v331_v60, %v330_v1 }
  0x9b   :  { %v276_v36 = vpop.f32.mrf.mxu1 }
  0x9c   :  { %v661_v37 = vpack.c.bf16 %v276_v36, %v274_v31  ;;  %v391_v7 = vmul.f32 %v276_v36, %v276_v36  ;;  %v369_v14 = vadd.f32 %v368_v6, %v276_v36 }
  0x9d   :  { %v843_v38 = vpop.f32.mrf.mxu2 }
  0x9e   :  { %700 = vst [vmem:[%s952_s5 + $0x8] sm:$0xff] %v661_v37   ;;  %v636_v39 = vpack.c.bf16 %v843_v38, %v836_v32  ;;  %v406_v20 = vadd.f32 %v405_v13, %v391_v7  ;;  %v339_v63 = vmul.f32 %v843_v38, %v843_v38 }
  0x9f   :  { %v140_v40 = vpop.f32.mrf.mxu0 }
  0xa0   :  { %696 = vst [vmem:[%s953_s4 + $0x20] sm:$0xff] %v636_v39   ;;  %v332_v3 = vmul.f32 %v140_v40, %v140_v40  ;;  %v310_v10 = vadd.f32 %v309_v2, %v140_v40 }
  0xa1   :  { %v853_v41 = vpop.f32.mrf.mxu3 }
  0xa2   :  { %v686_v42 = vpack.c.bf16 %v853_v41, %v838_v35  ;;  %v347_v17 = vadd.f32 %v346_v9, %v332_v3 }
  0xa3   :  { %v279_v43 = vpop.f32.mrf.mxu1 }
  0xa4   :  { %705 = vst [vmem:[%s952_s5 + $0x30] sm:$0xff] %v686_v42   ;;  %v392_v15 = vmul.f32 %v279_v43, %v279_v43  ;;  %v370_v21 = vadd.f32 %v369_v14, %v279_v43  ;;  %v399_v14 = vmul.f32 %v829_v29, %v829_v29 }
  0xa5   :  { %v860_v44 = vpop.f32.mrf.mxu2 }
  0xa6   :  { %v407_v27 = vadd.f32 %v406_v20, %v392_v15  ;;  %v340_v6 = vmul.f32 %v860_v44, %v860_v44 }
  0xa7   :  { %v142_v45 = vpop.f32.mrf.mxu0 }
  0xa8   :  { %v621_v46 = vpack.c.bf16 %v142_v45, %v140_v40  ;;  %v333_v11 = vmul.f32 %v142_v45, %v142_v45  ;;  %v311_v18 = vadd.f32 %v310_v10, %v142_v45 }
  0xa9   :  { %v862_v47 = vpop.f32.mrf.mxu3 }
  0xaa   :  { %693 = vst [vmem:[%s953_s4 + $0x8] sm:$0xff] %v621_v46   ;;  %v348_v23 = vadd.f32 %v347_v17, %v333_v11 }
  0xab   :  { %v281_v48 = vpop.f32.mrf.mxu1 }
  0xac   :  { %v666_v49 = vpack.c.bf16 %v281_v48, %v279_v43  ;;  %v393_v22 = vmul.f32 %v281_v48, %v281_v48  ;;  %v371_v28 = vadd.f32 %v370_v21, %v281_v48 }
  0xad   :  { %v867_v50 = vpop.f32.mrf.mxu2 }
  0xae   :  { %701 = vst [vmem:[%s952_s5 + $0x10] sm:$0xff] %v666_v49   ;;  %v641_v51 = vpack.c.bf16 %v867_v50, %v860_v44  ;;  %v408_v37 = vadd.f32 %v407_v27, %v393_v22 }
  0xaf   :  { %v145_v52 = vpop.f32.mrf.mxu0 }
  0xb0   :  { %697 = vst [vmem:[%s953_s4 + $0x28] sm:$0xff] %v641_v51   ;;  %v334_v19 = vmul.f32 %v145_v52, %v145_v52  ;;  %v312_v24 = vadd.f32 %v311_v18, %v145_v52 }
  0xb1   :  { %v877_v53 = vpop.f32.mrf.mxu3 }
  0xb2   :  { %v691_v55 = vpack.c.bf16 %v877_v53, %v862_v47  ;;  %v349_v33 = vadd.f32 %v348_v23, %v334_v19  ;;  %v400_v19 = vmul.f32 %v838_v35, %v838_v35 }
  0xb3   :  { %v284_v54 = vpop.f32.mrf.mxu1 }
  0xb4   :  { %706 = vst [vmem:[%s952_s5 + $0x38] sm:$0xff] %v691_v55   ;;  %v394_v30 = vmul.f32 %v284_v54, %v284_v54  ;;  %v372_v39 = vadd.f32 %v371_v28, %v284_v54 }
  0xb5   :  { %v881_v56 = vpop.f32.mrf.mxu2 }
  0xb6   :  { %v409_v49 = vadd.f32 %v408_v37, %v394_v30  ;;  %v403_v37 = vmul.f32 %v877_v53, %v877_v53 }
  0xb7   :  { %v147_v57 = vpop.f32.mrf.mxu0 }
  0xb8   :  { %v626_v58 = vpack.c.bf16 %v147_v57, %v145_v52  ;;  %v335_v26 = vmul.f32 %v147_v57, %v147_v57  ;;  %v313_v34 = vadd.f32 %v312_v24, %v147_v57 }
  0xba   :  { %694 = vst [vmem:[%s953_s4 + $0x10] sm:$0xff] %v626_v58   ;;  %v350_v45 = vadd.f32 %v349_v33, %v335_v26 }
  0xbb   :  { %v286_v0 = vpop.f32.mrf.mxu1 }
  0xbc   :  { %v671_v4 = vpack.c.bf16 %v286_v0, %v284_v54  ;;  %v395_v40 = vmul.f32 %v286_v0, %v286_v0  ;;  %v373_v51 = vadd.f32 %v372_v39, %v286_v0 }
  0xbd   :  { %v889_v8 = vpop.f32.mrf.mxu2 }
  0xbe   :  { %702 = vst [vmem:[%s952_s5 + $0x18] sm:$0xff] %v671_v4   ;;  %v646_v12 = vpack.c.bf16 %v889_v8, %v881_v56  ;;  %v410_v48 = vadd.f32 %v409_v49, %v395_v40 }
  0xbf   :  { %v150_v16 = vpop.f32.mrf.mxu0 }
  0xc0   :  { %698 = vst [vmem:[%s953_s4 + $0x30] sm:$0xff] %v646_v12   ;;  %v336_v36 = vmul.f32 %v150_v16, %v150_v16  ;;  %v314_v46 = vadd.f32 %v313_v34, %v150_v16 }
  0xc2   :  { %v351_v58 = vadd.f32 %v350_v45, %v336_v36 }
  0xc3   :  { %v289_v31 = vpop.f32.mrf.mxu1 }
  0xc4   :  { %v396_v43 = vmul.f32 %v289_v31, %v289_v31  ;;  %v374_v57 = vadd.f32 %v373_v51, %v289_v31 }
  0xc5   :  { %v170_v42 = vpop.f32.mrf.mxu2 }
  0xc6   :  { %v411_v0 = vadd.f32 %v410_v48, %v396_v43  ;;  %v344_v30 = vmul.f32 %v170_v42, %v170_v42 }
  0xc7   :  { %v152_v55 = vpop.f32.mrf.mxu0 }
  0xc8   :  { %v315_v52 = vadd.f32 %v314_v46, %v152_v55  ;;  %v337_v59 = vmul.f32 %v152_v55, %v152_v55  ;;  %v631_v60 = vpack.c.bf16 %v152_v55, %v150_v16 }
  0xca   :  { %v316_v62 = vadd.f32 %v315_v52, %v836_v32  ;;  %v352_v54 = vadd.f32 %v351_v58, %v337_v59  ;;  %695 = vst [vmem:[%s953_s4 + $0x18] sm:$0xff] %v631_v60   ;;  %v398_v32 = vmul.f32 %v824_v25, %v824_v25 }
  0xcb   :  { %v291_v1 = vpop.f32.mrf.mxu1 }
  0xcc   :  { %v317_v2 = vadd.f32 %v316_v62, %v843_v38  ;;  %v353_v3 = vadd.f32 %v352_v54, %v338_v61  ;;  %v375_v4 = vadd.f32 %v374_v57, %v291_v1  ;;  %v397_v5 = vmul.f32 %v291_v1, %v291_v1 }
  0xcd   :  { %v676_v7 = vpack.c.bf16 %v291_v1, %v289_v31  ;;  %v172_v9 = vpop.f32.mrf.mxu2  ;;  %v341_v38 = vmul.f32 %v867_v50, %v867_v50 }
  0xce   :  { %v318_v10 = vadd.f32 %v317_v2, %v860_v44  ;;  %v354_v11 = vadd.f32 %v353_v3, %v339_v63  ;;  %v376_v12 = vadd.f32 %v375_v4, %v824_v25  ;;  %v412_v13 = vadd.f32 %v411_v0, %v397_v5 }
  0xcf   :  { %703 = vst [vmem:[%s952_s5 + $0x20] sm:$0xff] %v676_v7   ;;  %v651_v15 = vpack.c.bf16 %v172_v9, %v170_v42  ;;  %v342_v25 = vmul.f32 %v881_v56, %v881_v56  ;;  %v345_v36 = vmul.f32 %v172_v9, %v172_v9 }
  0xd0   :  { %v355_v16 = vadd.f32 %v354_v11, %v340_v6  ;;  %v319_v17 = vadd.f32 %v318_v10, %v867_v50  ;;  %v377_v44 = vadd.f32 %v376_v12, %v829_v29  ;;  %v413_v18 = vadd.f32 %v412_v13, %v398_v32 }
  0xd1   :  { %699 = vst [vmem:[%s953_s4 + $0x38] sm:$0xff] %v651_v15   ;;  %v343_v29 = vmul.f32 %v889_v8, %v889_v8  ;;  %v401_v50 = vmul.f32 %v853_v41, %v853_v41 }
  0xd2   :  { %v320_v20 = vadd.f32 %v319_v17, %v881_v56  ;;  %v356_v21 = vadd.f32 %v355_v16, %v341_v38  ;;  %v414_v22 = vadd.f32 %v413_v18, %v399_v14  ;;  %v378_v23 = vadd.f32 %v377_v44, %v838_v35 }
  0xd3   :  { %v402_v56 = vmul.f32 %v862_v47, %v862_v47 }
  0xd4   :  { %v321_v24 = vadd.f32 %v320_v20, %v889_v8  ;;  %v357_v26 = vadd.f32 %v356_v21, %v342_v25  ;;  %v379_v27 = vadd.f32 %v378_v23, %v853_v41  ;;  %v415_v28 = vadd.f32 %v414_v22, %v400_v19 }
  0xd6   :  { %v322_v31 = vadd.f32 %v321_v24, %v170_v42  ;;  %v358_v33 = vadd.f32 %v357_v26, %v343_v29  ;;  %v380_v35 = vadd.f32 %v379_v27, %v862_v47  ;;  %v416_v34 = vadd.f32 %v415_v28, %v401_v50 }
  0xd8   :  { %v359_v39 = vadd.f32 %v358_v33, %v344_v30  ;;  %v323_v40 = vadd.f32 %v322_v31, %v172_v9  ;;  %v381_v8 = vadd.f32 %v380_v35, %v877_v53  ;;  %v417_v45 = vadd.f32 %v416_v34, %v402_v56 }
  0xda   :  { %v324_v41 = vrot.slane %v323_v40, 4  ;;  %v360_v46 = vadd.f32 %v359_v39, %v345_v36  ;;  %v382_v49 = vrot.slane %v381_v8, 4  ;;  %v418_v51 = vadd.f32 %v417_v45, %v403_v37 }
  0xdc   :  { %v325_v43 = vadd.f32 %v324_v41, %v323_v40  ;;  %v361_v55 = vrot.slane %v360_v46, 4  ;;  %v383_v42 = vadd.f32 %v382_v49, %v381_v8  ;;  %v419_v58 = vrot.slane %v418_v51, 4 }
  0xde   :  { %v326_v52 = vrot.slane %v325_v43, 2  ;;  %v362_v47 = vadd.f32 %v361_v55, %v360_v46  ;;  %v384_v59 = vrot.slane %v383_v42, 2  ;;  %v420_v60 = vadd.f32 %v419_v58, %v418_v51 }
  0xe0   :  { %v327_v48 = vadd.f32 %v326_v52, %v325_v43  ;;  %v363_v61 = vrot.slane %v362_v47, 2  ;;  %v385_v57 = vadd.f32 %v384_v59, %v383_v42  ;;  %v421_v62 = vrot.slane %v420_v60, 2 }
  0xe2   :  { %v328_v54 = vrot.slane %v327_v48, 1  ;;  %v364_v63 = vadd.f32 %v363_v61, %v362_v47  ;;  %v422_v53 = vadd.f32 %v421_v62, %v420_v60  ;;  %v386_v0 = vrot.slane %v385_v57, 1 }
  0xe4   :  { %v365_v1 = vrot.slane %v364_v63, 1  ;;  %v423_v2 = vrot.slane %v422_v53, 1  ;;  %v329_v3 = vadd.f32 %v328_v54, %v327_v48  ;;  %v387_v5 = vadd.f32 %v386_v0, %v385_v57 }
  0xe6   :  { %v366_v4 = vadd.f32 %v365_v1, %v364_v63  ;;  %v424_v32 = vadd.f32 %v423_v2, %v422_v53 }
  0xe8   :  { %v426_v6 = vsel %vm425_vm3, %v329_v3, %v366_v4 }
  0xe9   :  { %v427_v7 = vsel %vm122_vm0, %v426_v6, %v387_v5 }
  0xea   :  { %v429_v9 = vsel %vm428_vm4, %v427_v7, %v424_v32 }
  0xeb   :  { %430 = vst [vmem:[%s954_s6] sm:$0xf] %v429_v9 }

// kernel: _lambda_.5
= control target key start
LH: loop header
LB: loop body
LE: loop exit
PB: predicated region body
PF: predicated region fallthrough
CT: control target
= control target key end

     0   :  { %11 = vsyncpa [#allocation3], 0  ;;  %s840_s0 = inlined_call_operand.vmem [shape: bf16[2,64,128], index: 0, kind: input, shape index: {}]   ;;  %s841_s1 = inlined_call_operand.vmem [shape: bf16[2,64,128], index: 1, kind: input, shape index: {}]   ;;  %s842_s2 = inlined_call_operand.vmem [shape: f32[1,128], index: 2, kind: input, shape index: {}]   ;;  %s843_s3 = inlined_call_operand.vmem [shape: f32[1,128], index: 3, kind: input, shape index: {}]   ;;  %s844_s4 = inlined_call_operand.vmem [shape: f32[1,128], index: 4, kind: input, shape index: {}]   ;;  %s845_s5 = inlined_call_operand.vmem [shape: f32[1,128], index: 5, kind: input, shape index: {}]   ;;  %s846_s6 = inlined_call_operand.hbm [shape: f32[2,64,128], index: 6, kind: output, shape index: {}]  }
   0x1   :  { %13 = vsyncpa [#allocation3 + $0x1], 0  ;;  %s673_s21 = smov 0   ;;  %s675_s22 = smov 0  }
   0x2   :  { %s677_s23 = smov 0   ;;  %s679_s24 = smov 0  }
   0x3 LB: > { %s694_s25 = sadd.s32 4294967295, %s634_s24   ;;  %s472_s26 = sadd.s32 4294967294, %s634_s24   ;;  %s634_s24 = sphi %s679_s24, %s852_s24   ;;  %s630_s23 = sphi %s677_s23, %s851_s23   ;;  %s626_s22 = sphi %s675_s22, %s850_s22   ;;  %s622_s21 = sphi %s673_s21, %s849_s21  }
   0x4   : > { %s698_s27 = sadd.s32 1, %s634_s24   ;;  %s162_s28 = sadd.s32 1, %s630_s23 }
   0x5   : > { %s159_s29 = ssub.s32 %s634_s24, %s698_s27  ;;  %p172_p0 = scmp.ne.s32.totalorder %s630_s23, %s626_s22 }
   0x6   : > { %p160_p1 = scmp.eq.s32.totalorder %s159_s29, 0  ;;  %p173_p2 = scmp.eq.s32.totalorder %s694_s25, 1 }
   0x7   : > { %p178_p3 = scmp.ne.s32.totalorder %s626_s22, %s622_s21  ;;  %p179_p4 = scmp.eq.s32.totalorder %s472_s26, 1 }
   0x8   : > { %s709_s30 = scalar_select %p160_p1, %s630_s23, %s162_s28  }
   0x9   : > { %p711_p5 = por %p173_p2, %p172_p0  ;;  %p715_p6 = por %p179_p4, %p178_p3 }
   0xa   : > { %p475_p7 = scmp.ge.s32.totalorder %s634_s24, 1  ;;  %p225_p8 = scmp.lt.s32.totalorder %s634_s24, 3 }
   0xc   : > { %p226_p9 = pnand %p475_p7, %p225_p8 }
   0xd   : > { %p260_p10 = scmp.lt.s32.totalorder (!%p226_p9), %s694_s25, 1  ;;  %s592_s29 = scalar_lea.hbm (!%p226_p9), %s846_s6, 128 }
   0xe   : > { %229 = sbr.rel (%p226_p9) target bundleno = 53 (0x35), region = 44 }
  0x13   : > { %s261_s9 = scalar_select %p260_p10, %s694_s25, 1  ;;  %v736_v0 = vld [vmem:[%s842_s2] ss:$0 sm:$0xff] }
  0x14   : > { %v741_v1 = vld [vmem:[%s844_s4] ss:$0 sm:$0xff] }
  0x15   : > { %s486_s10 = sshll.u32 %s261_s9, 5  ;;  %v749_v6 = vld [vmem:[%s843_s3] ss:$0 sm:$0xff] }
  0x16   : > { %s726_s13 = scalar_lea.vmem %s840_s0, %s486_s10  ;;  %s731_s16 = scalar_lea.vmem %s841_s1, %s486_s10  ;;  %v754_v8 = vld [vmem:[%s845_s5] ss:$0 sm:$0xff] }
  0x17   : > { %v490_v2 = vld [vmem:[%s726_s13] sm:$0xff]   ;;  %v521_v4 = vld [vmem:[%s726_s13 + $0x8] sm:$0xff]   ;;  %s257_s10 = sand.u32 1, %s626_s22   ;;  %v522_v24 = vld [vmem:[%s726_s13 + $0x10] sm:$0xff]  }
  0x18   : > { %v506_v3 = vld [vmem:[%s731_s16] sm:$0xff]   ;;  %v491_v5 = vunpack.c.l.bf16 %v490_v2  ;;  %v492_v9 = vunpack.c.h.bf16 %v490_v2  ;;  %v524_v11 = vld [vmem:[%s731_s16 + $0x8] sm:$0xff]   ;;  %v495_v12 = vunpack.c.l.bf16 %v521_v4  ;;  %v496_v14 = vunpack.c.h.bf16 %v521_v4  ;;  %v525_v25 = vld [vmem:[%s731_s16 + $0x10] sm:$0xff]   ;;  %s476_s11 = sshll.u32 %s257_s10, 6  ;;  %s383_s18 = scalar_lea.sflag [#allocation3], %s257_s10 }
  0x19   : > { %v507_v7 = vunpack.c.l.bf16 %v506_v3  ;;  %v508_v10 = vunpack.c.h.bf16 %v506_v3  ;;  %v511_v13 = vunpack.c.l.bf16 %v524_v11  ;;  %v512_v15 = vunpack.c.h.bf16 %v524_v11  ;;  %v523_v50 = vld [vmem:[%s726_s13 + $0x18] sm:$0xff]   ;;  %s788_s12 = scalar_lea.vmem [#allocation2], %s476_s11  ;;  %s488_s13 = sshll.u32 %s694_s25, 6 }
  0x1a   : > { %v290_v16 = vmul.f32 %v736_v0, %v491_v5  ;;  %v291_v18 = vmul.f32 %v736_v0, %v492_v9  ;;  %v292_v20 = vmul.f32 %v736_v0, %v495_v12  ;;  %v293_v22 = vmul.f32 %v736_v0, %v496_v14  ;;  %v526_v51 = vld [vmem:[%s731_s16 + $0x18] sm:$0xff]   ;;  %s394_s25 = scalar_lea.hbm %s846_s6, %s488_s13  ;;  %s395_s16 = sshll.u32 %s788_s12, 4  ;;  %s396_s16 = int_to_ptr.vmem [resolvable:$true] %s395_s16 }
  0x1b   : > { %v338_v17 = vmul.f32 %v741_v1, %v507_v7  ;;  %v339_v19 = vmul.f32 %v741_v1, %v508_v10  ;;  %v340_v21 = vmul.f32 %v741_v1, %v511_v13  ;;  %v341_v23 = vmul.f32 %v741_v1, %v512_v15  ;;  %s397_s17 = sshll.u32 %s394_s25, 4  ;;  %s398_s17 = int_to_ptr.hbm [resolvable:$true] %s397_s17 }
  0x1c   : > { %v302_v26 = vadd.f32 %v749_v6, %v290_v16  ;;  %v303_v28 = vadd.f32 %v749_v6, %v291_v18  ;;  %v304_v30 = vadd.f32 %v749_v6, %v292_v20  ;;  %v305_v32 = vadd.f32 %v749_v6, %v293_v22  ;;  %s586_s19 = sshra.s32 %s398_s17, 4  ;;  %s587_s19 = int_to_ptr.hbm [resolvable:$true] %s586_s19 }
  0x1d   : > { %v350_v27 = vadd.f32 %v754_v8, %v338_v17  ;;  %v351_v29 = vadd.f32 %v754_v8, %v339_v19  ;;  %v352_v31 = vadd.f32 %v754_v8, %v340_v21  ;;  %v353_v33 = vadd.f32 %v754_v8, %v341_v23  ;;  %s588_s20 = scalar_lea.hbm %s587_s19, 64  ;;  %p593_p0 = scmp.lt.s32.totalorder %s587_s19, %s846_s6 }
  0x1e   : > { %v310_v34 = vmax.f32 %v302_v26, 0.0  ;;  %v311_v35 = vmax.f32 %v303_v28, 0.0  ;;  %v499_v36 = vunpack.c.l.bf16 %v522_v24  ;;  %v515_v37 = vunpack.c.l.bf16 %v525_v25  ;;  %p589_p11 = scmp.ne.s32.totalorder %s587_s19, %s588_s20  ;;  %p594_p1 = scmp.lt.s32.totalorder %s592_s29, %s588_s20 }
  0x1f   : > { %v312_v38 = vmax.f32 %v304_v30, 0.0  ;;  %v313_v39 = vmax.f32 %v305_v32, 0.0  ;;  %v500_v40 = vunpack.c.h.bf16 %v522_v24  ;;  %v516_v41 = vunpack.c.h.bf16 %v525_v25 }
  0x20   : > { %v358_v42 = vadd.f32 %v350_v27, %v310_v34  ;;  %v359_v43 = vadd.f32 %v351_v29, %v311_v35  ;;  %v294_v44 = vmul.f32 %v736_v0, %v499_v36  ;;  %v342_v45 = vmul.f32 %v741_v1, %v515_v37  ;;  %p590_p12 = pnand %p589_p11, %p711_p5  ;;  %p595_p2 = por %p594_p1, %p593_p0 }
  0x21   : > { %v360_v46 = vadd.f32 %v352_v31, %v312_v38  ;;  %v361_v47 = vadd.f32 %v353_v33, %v313_v39  ;;  %v295_v48 = vmul.f32 %v736_v0, %v500_v40  ;;  %v343_v49 = vmul.f32 %v741_v1, %v516_v41 }
  0x22   : > { %v366_v52 = vmax.f32 %v358_v42, 0.0  ;;  %v367_v53 = vmax.f32 %v359_v43, 0.0  ;;  %v306_v54 = vadd.f32 %v749_v6, %v294_v44  ;;  %v354_v55 = vadd.f32 %v754_v8, %v342_v45  ;;  %p591_p13 = pneg %p590_p12 }
  0x23   : > { %v368_v56 = vmax.f32 %v360_v46, 0.0  ;;  %v369_v57 = vmax.f32 %v361_v47, 0.0  ;;  %v307_v58 = vadd.f32 %v749_v6, %v295_v48  ;;  %v355_v59 = vadd.f32 %v754_v8, %v343_v49 }
  0x24   : > { %374 = vst [vmem:[%s788_s12] sm:$0xff] %v366_v52  ;;  %v314_v60 = vmax.f32 %v306_v54, 0.0  ;;  %v503_v61 = vunpack.c.l.bf16 %v523_v50  ;;  %v519_v62 = vunpack.c.l.bf16 %v526_v51  ;;  %v504_v63 = vunpack.c.h.bf16 %v523_v50  ;;  %p596_p3 = pnand %p595_p2, %p591_p13 }
  0x25   : > { %375 = vst [vmem:[%s788_s12 + $0x8] sm:$0xff] %v367_v53  ;;  %v315_v2 = vmax.f32 %v307_v58, 0.0  ;;  %v520_v3 = vunpack.c.h.bf16 %v526_v51 }
  0x26   : > { %376 = vst [vmem:[%s788_s12 + $0x10] sm:$0xff] %v368_v56  ;;  %v362_v4 = vadd.f32 %v354_v55, %v314_v60  ;;  %v296_v5 = vmul.f32 %v736_v0, %v503_v61  ;;  %v344_v7 = vmul.f32 %v741_v1, %v519_v62  ;;  %v297_v9 = vmul.f32 %v736_v0, %v504_v63 }
  0x27   : > { %377 = vst [vmem:[%s788_s12 + $0x18] sm:$0xff] %v369_v57  ;;  %v363_v10 = vadd.f32 %v355_v59, %v315_v2  ;;  %v345_v11 = vmul.f32 %v741_v1, %v520_v3 }
  0x28   : > { %v370_v12 = vmax.f32 %v362_v4, 0.0  ;;  %v308_v13 = vadd.f32 %v749_v6, %v296_v5  ;;  %v356_v14 = vadd.f32 %v754_v8, %v344_v7  ;;  %v309_v15 = vadd.f32 %v749_v6, %v297_v9 }
  0x29   : > { %v371_v16 = vmax.f32 %v363_v10, 0.0  ;;  %v357_v17 = vadd.f32 %v754_v8, %v345_v11 }
  0x2a   : > { %378 = vst [vmem:[%s788_s12 + $0x20] sm:$0xff] %v370_v12  ;;  %v316_v0 = vmax.f32 %v308_v13, 0.0  ;;  %v317_v1 = vmax.f32 %v309_v15, 0.0 }
  0x2b   : > { %379 = vst [vmem:[%s788_s12 + $0x28] sm:$0xff] %v371_v16 }
  0x2c   : > { %v364_v18 = vadd.f32 %v356_v14, %v316_v0  ;;  %v365_v19 = vadd.f32 %v357_v17, %v317_v1 }
  0x2e   : > { %v372_v6 = vmax.f32 %v364_v18, 0.0  ;;  %v373_v20 = vmax.f32 %v365_v19, 0.0 }
  0x30   : > { %380 = vst [vmem:[%s788_s12 + $0x30] sm:$0xff] %v372_v6 }
  0x31   : > { %381 = vst [vmem:[%s788_s12 + $0x38] sm:$0xff] %v373_v20 }
  0x32   : > { %599 = shalt.err (!%p596_p3)
}
  0x33   : > { %s636_s10 = smov 128   ;;  %s637_s12 = smov 8  }
  0x34   : > { %527 = dma.vmem_to_hbm [thread:$0]  (%p711_p5), %s396_s16, 1024, %s398_s17, %s383_s18, %s636_s10, %s636_s10, %s637_s12  }
  0x35 PF: > { %p533_p4 = scmp.ge.s32.totalorder %s634_s24, 2  ;;  %s412_s13 = sand.u32 1, %s622_s21  }
  0x36   : > { %s413_s14 = scalar_lea.sflag [#allocation3], %s412_s13 }
  0x37   : > { %p530_p7 = pnand %p533_p4, %p715_p6 }
  0x39   : > { %p531_p8 = pneg %p530_p7 }
  0x3b   : > { %617 = dma.done.wait (%p531_p8), %s413_s14, 1024  }
  0x3c   : > { %619 = vsyncadd (%p531_p8), %s413_s14, 4294966272  ;;  %p16_p9 = scmp.ge.s32.totalorder %s698_s27, 4   ;;  %s849_s21 = smov %s626_s22 }
  0x3d   : > { %s850_s22 = smov %s630_s23  ;;  %s851_s23 = smov %s709_s30 }
  0x3e   : > { %s852_s24 = smov %s698_s27  ;;  %18 = sbr.rel (!%p16_p9) target bundleno = 3 (0x3), region = 82 }
  0x43   :  { %419 = vsyncpa [#allocation3], 1 }
  0x44   :  { %421 = vsyncpa [#allocation3 + $0x1], 1 }

// kernel: _lambda_.4
= control target key start
LH: loop header
LB: loop body
LE: loop exit
PB: predicated region body
PF: predicated region fallthrough
CT: control target
= control target key end

     0   :  { %s2118_s12 = smov 0   ;;  %s2677_s0 = inlined_call_operand.vmem [shape: bf16[2,10,10,128], index: 0, kind: input, shape index: {}]   ;;  %s2678_s1 = inlined_call_operand.vmem [shape: bf16[9,128,128], index: 1, kind: input, shape index: {}]   ;;  %s2679_s2 = inlined_call_operand.vmem [shape: bf16[2,64,128], index: 2, kind: output, shape index: {0}]   ;;  %s2680_s3 = inlined_call_operand.vmem [shape: f32[2,2,128], index: 3, kind: output, shape index: {1}]  }
   0x1 LB: > { %s1532_s13 = sadd.s32 4294967295, %s2096_s12   ;;  %p1536_p0 = scmp.ge.s32.totalorder %s2096_s12, 1  ;;  %s2096_s12 = sphi %s2118_s12, %s14_s12  }
   0x2   : > { %p140_p1 = scmp.lt.s32.totalorder %s2096_s12, 3 }
   0x4   : > { %p141_p2 = pnand %p1536_p0, %p140_p1 }
   0x5   : > { %p168_p3 = scmp.lt.s32.totalorder (!%p141_p2), %s1532_s13, 1 }
   0x6   : > { %144 = sbr.rel (%p141_p2) target bundleno = 347 (0x15b), region = 28 }
   0xb   : > { %v1985_v0 = vld [vmem:[%s2678_s1 + $0x78] sm:$0xff]  ;;  %v1984_v2 = vld [vmem:[%s2678_s1 + $0x70] sm:$0xff]  ;;  %s2686_s13 = smov (!%p168_p3, %s1532_s13), 1  ;;  %v1983_v5 = vld [vmem:[%s2678_s1 + $0x68] sm:$0xff]  ;;  %vm218_vm0 = vsmask.f32 3328 }
   0xc   : > { %v1993_v1 = vld [vmem:[%s2678_s1 + $0xb8] sm:$0xff]  ;;  %2065 = vmatpush.bf16.msra.mxu1 %v1985_v0  ;;  %414 = vmatpush.bf16.msra.mxu0 %v1985_v0  ;;  %v1992_v3 = vld [vmem:[%s2678_s1 + $0xb0] sm:$0xff]  ;;  %s2081_s24 = smul.u32 80, %s2686_s13  ;;  %v1991_v7 = vld [vmem:[%s2678_s1 + $0xa8] sm:$0xff]  ;;  %vm219_vm1 = vsmask.f32 7440 }
   0xd   : > { %668 = vmatpush.bf16.msra.mxu2 %v1993_v1  ;;  %v2001_v4 = vld [vmem:[%s2678_s1 + $0xf8] sm:$0xff]  ;;  %v2000_v6 = vld [vmem:[%s2678_s1 + $0xf0] sm:$0xff]  ;;  %vm552_vm2 = vcmask 1042432   ;;  %v1982_v11 = vld [vmem:[%s2678_s1 + $0x60] sm:$0xff]  ;;  %vm553_vm3 = vcmask 1046532   ;;  %s1540_s20 = sshll.u32 %s2686_s13, 1 }
   0xe   : > { %780 = vmatpush.bf16.msra.mxu3 %v2001_v4  ;;  %s2156_s6 = scalar_lea.vmem %s2677_s0, %s2081_s24  ;;  %v1990_v17 = vld [vmem:[%s2678_s1 + $0xa0] sm:$0xff]  ;;  %v1999_v18 = vld [vmem:[%s2678_s1 + $0xe8] sm:$0xff]  ;;  %v1981_v39 = vld [vmem:[%s2678_s1 + $0x58] sm:$0xff]  ;;  %vm1427_vm6 = vcmask 1040384   ;;  %s181_s23 = scalar_lea.vmem %s2680_s3, %s1540_s20 }
   0xf   : > { %v2159_v8 = vld [vmem:[%s2156_s6 + $0x20] sm:$0xf]  ;;  %v2162_v9 = vld [vmem:[%s2156_s6 + $0x24] sm:$0x1]  ;;  %v2165_v10 = vld [vmem:[%s2156_s6 + $0x28] sm:$0xf] }
  0x10   : > { %2066 = vmatpush.bf16.msra.mxu1 %v1984_v2  ;;  %415 = vmatpush.bf16.msra.mxu0 %v1984_v2  ;;  %v2171_v12 = vld [vmem:[%s2156_s6 + $0x2c] sm:$0x1]  ;;  %v278_v13 = vshrl.u32 %v2159_v8, 16  ;;  %v281_v14 = vshll.u32 %v2159_v8, 16  ;;  %v287_v15 = vshll.u32 %v2162_v9, 16  ;;  %v292_v16 = vshrl.u32 %v2165_v10, 16  ;;  %vm2208_vm4 = vmor %vm218_vm0, %vm219_vm1 }
  0x11   : > { %669 = vmatpush.bf16.msra.mxu2 %v1992_v3  ;;  %v295_v19 = vshll.u32 %v2165_v10, 16  ;;  %v2185_v20 = vld [vmem:[%s2156_s6] sm:$0xf]  ;;  %v301_v24 = vshll.u32 %v2171_v12, 16  ;;  %v183_v25 = vld [vmem:[%s2156_s6 + $0x4] sm:$0x1]  ;;  %vm2214_vm5 = vmor %vm552_vm2, %vm553_vm3 }
  0x12   : > { %781 = vmatpush.bf16.msra.mxu3 %v2000_v6  ;;  %v280_v21 = vrot.slane %v278_v13, 4  ;;  %v283_v22 = vrot.slane %v281_v14, 5  ;;  %v294_v23 = vrot.slane %v292_v16, 4  ;;  %v289_v26 = vrot.slane %v287_v15, 5  ;;  %v2190_v28 = vld [vmem:[%s2156_s6 + $0x8] sm:$0xf] }
  0x13   : > { %v297_v27 = vrot.slane %v295_v19, 5  ;;  %v185_v29 = vld [vmem:[%s2156_s6 + $0xc] sm:$0x1]  ;;  %v222_v31 = vshrl.u32 %v2185_v20, 16  ;;  %v225_v32 = vshll.u32 %v2185_v20, 16  ;;  %v231_v33 = vshll.u32 %v183_v25, 16 }
  0x14   : > { %2067 = vmatpush.bf16.msra.mxu1 %v1983_v5  ;;  %416 = vmatpush.bf16.msra.mxu0 %v1983_v5  ;;  %v284_v30 = vor.u32 %v283_v22, %v280_v21  ;;  %v1998_v35 = vld [vmem:[%s2678_s1 + $0xe0] sm:$0xff]  ;;  %v236_v36 = vshrl.u32 %v2190_v28, 16  ;;  %v239_v37 = vshll.u32 %v2190_v28, 16  ;;  %v245_v38 = vshll.u32 %v185_v29, 16  ;;  %v1989_v44 = vld [vmem:[%s2678_s1 + $0x98] sm:$0xff]  ;;  %v1980_v59 = vld [vmem:[%s2678_s1 + $0x50] sm:$0xff] }
  0x15   : > { %670 = vmatpush.bf16.msra.mxu2 %v1991_v7  ;;  %v298_v34 = vor.u32 %v297_v27, %v294_v23  ;;  %v303_v41 = vrot.slane %v301_v24, 5  ;;  %v224_v42 = vrot.slane %v222_v31, 4  ;;  %v227_v43 = vrot.slane %v225_v32, 5  ;;  %v1997_v56 = vld [vmem:[%s2678_s1 + $0xd8] sm:$0xff]  ;;  %v2224_v58 = vld [vmem:[%s2156_s6 + $0x30] sm:$0xf] }
  0x16   : > { %782 = vmatpush.bf16.msra.mxu3 %v1999_v18  ;;  %v285_v40 = vrot.slane %v284_v30, 4  ;;  %v238_v47 = vrot.slane %v236_v36, 4  ;;  %v241_v48 = vrot.slane %v239_v37, 5  ;;  %v233_v50 = vrot.slane %v231_v33, 5  ;;  %v1988_v0 = vld [vmem:[%s2678_s1 + $0x90] sm:$0xff]  ;;  %v1987_v18 = vld [vmem:[%s2678_s1 + $0x88] sm:$0xff] }
  0x17   : > { %v299_v46 = vrot.slane %v298_v34, 4  ;;  %v228_v49 = vor.u32 %v227_v43, %v224_v42  ;;  %v1621_v52 = vrot.slane %v2185_v20, 9  ;;  %v557_v53 = vrot.slane %v183_v25, 5  ;;  %v2239_v3 = vld [vmem:[%s2156_s6 + $0x38] sm:$0xf]  ;;  %v1996_v16 = vld [vmem:[%s2678_s1 + $0xd0] sm:$0xff] }
  0x18   : > { %2068 = vmatpush.bf16.msra.mxu1 %v1982_v11  ;;  %417 = vmatpush.bf16.msra.mxu0 %v1982_v11  ;;  %v242_v54 = vor.u32 %v241_v48, %v238_v47  ;;  %v247_v55 = vrot.slane %v245_v38, 5  ;;  %v1622_v57 = vrot.slane %v2190_v28, 9  ;;  %v290_v60 = vsel %vm2208_vm4, %v285_v40, %v289_v26  ;;  %v2250_v11 = vld [vmem:[%s2156_s6 + $0x10] sm:$0xf]  ;;  %v2274_v25 = vld [vmem:[%s2156_s6 + $0x34] sm:$0x1] }
  0x19   : > { %671 = vmatpush.bf16.msra.mxu2 %v1990_v17  ;;  %v304_v61 = vsel %vm2208_vm4, %v299_v46, %v303_v41  ;;  %v229_v62 = vrot.slane %v228_v49, 4  ;;  %v561_v63 = vrot.slane %v185_v29, 5  ;;  %v558_v2 = vsel %vm2214_vm5, %v1621_v52, %v557_v53  ;;  %v1979_v17 = vld [vmem:[%s2678_s1 + $0x48] sm:$0xff]  ;;  %v2278_v27 = vld [vmem:[%s2156_s6 + $0x18] sm:$0xf]  ;;  %v1978_v34 = vld [vmem:[%s2678_s1 + $0x40] sm:$0xff] }
  0x1a   : > { %783 = vmatpush.bf16.msra.mxu3 %v1998_v35  ;;  %v243_v1 = vrot.slane %v242_v54, 4  ;;  %v306_v6 = vshrl.u32 %v2224_v58, 16  ;;  %v309_v7 = vshll.u32 %v2224_v58, 16  ;;  %v2252_v13 = vunpack.c.l.b16 %v290_v60  ;;  %v2282_v30 = vld [vmem:[%s2156_s6 + $0x3c] sm:$0x1]  ;;  %v1995_v36 = vld [vmem:[%s2678_s1 + $0xc8] sm:$0xff] }
  0x1b   : > { %v234_v4 = vsel %vm2208_vm4, %v229_v62, %v233_v50  ;;  %v2245_v5 = vsel %vm2214_vm5, %v1622_v57, %v561_v63  ;;  %v2254_v14 = vunpack.c.l.b16 %v304_v61  ;;  %v604_v21 = vunpack.c.l.b16 %v558_v2  ;;  %v2297_v40 = vld [vmem:[%s2156_s6 + $0x1c] sm:$0x1]  ;;  %v1986_v47 = vld [vmem:[%s2678_s1 + $0x80] sm:$0xff] }
  0x1c   : > { %2069 = vmatpush.bf16.msra.mxu1 %v1981_v39  ;;  %418 = vmatpush.bf16.msra.mxu0 %v1981_v39  ;;  %v248_v15 = vsel %vm2208_vm4, %v243_v1, %v247_v55  ;;  %v2267_v19 = vunpack.c.l.b16 %v234_v4  ;;  %v320_v22 = vshrl.u32 %v2239_v3, 16  ;;  %v605_v24 = vunpack.c.l.b16 %v2245_v5  ;;  %v187_v39 = vld [vmem:[%s2156_s6 + $0x14] sm:$0x1]  ;;  %v1977_v46 = vld [vmem:[%s2678_s1 + $0x38] sm:$0xff] }
  0x1d   : > { %672 = vmatpush.bf16.msra.mxu2 %v1989_v44  ;;  %v2270_v23 = vunpack.c.l.b16 %v248_v15  ;;  %v323_v26 = vshll.u32 %v2239_v3, 16  ;;  %v250_v29 = vshrl.u32 %v2250_v11, 16  ;;  %v308_v31 = vrot.slane %v306_v6, 4  ;;  %v2009_v53 = vld [vmem:[%s2678_s1 + $0x138] sm:$0xff] }
  0x1e   : > { %784 = vmatpush.bf16.msra.mxu3 %v1997_v56  ;;  %v311_v32 = vrot.slane %v309_v7, 5  ;;  %v253_v33 = vshll.u32 %v2250_v11, 16  ;;  %v2290_v35 = vpack.c.b16 %v2254_v14, %v2252_v13  ;;  %v322_v37 = vrot.slane %v320_v22, 4  ;;  %v2025_v55 = vld [vmem:[%s2678_s1 + $0x1b8] sm:$0xff]  ;;  %v1976_v7 = vld [vmem:[%s2678_s1 + $0x30] sm:$0xff] }
  0x1f   : > { %v325_v38 = vrot.slane %v323_v26, 5  ;;  %v252_v41 = vrot.slane %v250_v29, 4  ;;  %v264_v43 = vshrl.u32 %v2278_v27, 16  ;;  %v267_v44 = vshll.u32 %v2278_v27, 16  ;;  %v2033_v15 = vld [vmem:[%s2678_s1 + $0x1f8] sm:$0xff] }
  0x20   : > { %2070 = vmatpush.bf16.msra.mxu1 %v1980_v59  ;;  %419 = vmatpush.bf16.msra.mxu0 %v1980_v59  ;;  %v255_v42 = vrot.slane %v253_v33, 5  ;;  %v358_v48 = vpack.c.b16 %v2270_v23, %v2267_v19  ;;  %v612_v49 = vpack.c.b16 %v605_v24, %v604_v21  ;;  %v315_v50 = vshll.u32 %v2274_v25, 16  ;;  %v2024_v21 = vld [vmem:[%s2678_s1 + $0x1b0] sm:$0xff] }
  0x21   : > { %673 = vmatpush.bf16.msra.mxu2 %v1988_v0  ;;  %v329_v52 = vshll.u32 %v2282_v30, 16  ;;  %v312_v54 = vor.u32 %v311_v32, %v308_v31  ;;  %v259_v56 = vshll.u32 %v187_v39, 16  ;;  %v266_v57 = vrot.slane %v264_v43, 4  ;;  %v1994_v0 = vld [vmem:[%s2678_s1 + $0xc0] sm:$0xff]  ;;  %v2007_v43 = vld [vmem:[%s2678_s1 + $0x128] sm:$0xff] }
  0x22   : > { %785 = vmatpush.bf16.msra.mxu3 %v1996_v16  ;;  %v269_v59 = vrot.slane %v267_v44, 5  ;;  %v326_v60 = vor.u32 %v325_v38, %v322_v37  ;;  %v273_v61 = vshll.u32 %v2297_v40, 16  ;;  %v452_v62 = vunpack.c.l.b16 %v2190_v28  ;;  %v2008_v16 = vld [vmem:[%s2678_s1 + $0x130] sm:$0xff]  ;;  %v1975_v37 = vld [vmem:[%s2678_s1 + $0x28] sm:$0xff] }
  0x23   : > { %v453_v63 = vunpack.c.l.b16 %v2250_v11  ;;  %v256_v1 = vor.u32 %v255_v42, %v252_v41  ;;  %v1623_v4 = vrot.slane %v2250_v11, 9  ;;  %v565_v6 = vrot.slane %v187_v39, 5  ;;  %v2032_v42 = vld [vmem:[%s2678_s1 + $0x1f0] sm:$0xff]  ;;  %v2023_v44 = vld [vmem:[%s2678_s1 + $0x1a8] sm:$0xff] }
  0x24   : > { %2071 = vmatpush.bf16.msra.mxu1 %v1979_v17  ;;  %420 = vmatpush.bf16.msra.mxu0 %v1979_v17  ;;  %v270_v2 = vor.u32 %v269_v59, %v266_v57  ;;  %v317_v17 = vrot.slane %v315_v50, 5  ;;  %v313_v22 = vrot.slane %v312_v54, 4  ;;  %v261_v26 = vrot.slane %v259_v56, 5  ;;  %v2006_v50 = vld [vmem:[%s2678_s1 + $0x120] sm:$0xff]  ;;  %v1973_v59 = vld [vmem:[%s2678_s1 + $0x18] sm:$0xff]  ;;  %v2015_v28 = vld [vmem:[%s2678_s1 + $0x168] sm:$0xff] }
  0x25   : > { %674 = vmatpush.bf16.msra.mxu2 %v1987_v18  ;;  %v331_v18 = vrot.slane %v329_v52, 5  ;;  %v566_v19 = vsel %vm2214_vm5, %v1623_v4, %v565_v6  ;;  %v724_v29 = vpack.c.b16 %v453_v63, %v452_v62  ;;  %v327_v32 = vrot.slane %v326_v60, 4  ;;  %v2022_v52 = vld [vmem:[%s2678_s1 + $0x1a0] sm:$0xff]  ;;  %v2005_v60 = vld [vmem:[%s2678_s1 + $0x118] sm:$0xff]  ;;  %v1972_v6 = vld [vmem:[%s2678_s1 + $0x10] sm:$0xff] }
  0x26   : > { %786 = vmatpush.bf16.msra.mxu3 %v1995_v36  ;;  %v606_v31 = vunpack.c.l.b16 %v566_v19  ;;  %v257_v33 = vrot.slane %v256_v1, 4  ;;  %v275_v36 = vrot.slane %v273_v61, 5  ;;  %v1624_v38 = vrot.slane %v2278_v27, 9 }
  0x27   : > { %v569_v39 = vrot.slane %v2297_v40, 5  ;;  %v318_v5 = vsel %vm2208_vm4, %v313_v22, %v317_v17  ;;  %v454_v1 = vunpack.c.l.b16 %v2278_v27  ;;  %v2030_v17 = vld [vmem:[%s2678_s1 + $0x1e0] sm:$0xff]  ;;  %v1625_v19 = vrot.slane %v2159_v8, 9 }
  0x28   : > { %2072 = vmatpush.bf16.msra.mxu1 %v1978_v34  ;;  %421 = vmatpush.bf16.msra.mxu0 %v1978_v34  ;;  %v271_v34 = vrot.slane %v270_v2, 4  ;;  %v2352_v41 = vpack.c.b16 %v606_v31, %v605_v24  ;;  %v332_v24 = vsel %vm2208_vm4, %v327_v32, %v331_v18  ;;  %v262_v40 = vsel %vm2208_vm4, %v257_v33, %v261_v26  ;;  %v1971_v18 = vld [vmem:[%s2678_s1 + $0x8] sm:$0xff]  ;;  %v2029_v32 = vld [vmem:[%s2678_s1 + $0x1d8] sm:$0xff]  ;;  %v2026_v27 = vld [vmem:[%s2678_s1 + $0x1c0] sm:$0xff] }
  0x29   : > { %675 = vmatpush.bf16.msra.mxu2 %v1986_v47  ;;  %v1974_v47 = vld [vmem:[%s2678_s1 + $0x20] sm:$0xff]  ;;  %v2389_v54 = vunpack.c.l.b16 %v332_v24  ;;  %v455_v2 = vunpack.c.l.b16 %v2159_v8  ;;  %v1626_v22 = vrot.slane %v2165_v10, 9  ;;  %v577_v26 = vrot.slane %v2171_v12, 5 }
  0x2a   : > { %787 = vmatpush.bf16.msra.mxu3 %v1994_v0  ;;  %v457_v24 = vunpack.c.l.b16 %v2224_v58 }
  0x2b   : > { %432 = vmatmul.bf16.vlgmr.msra.gmra.mxu1 %v2290_v35  ;;  %422 = vmatmul.bf16.vlgmr.msra.gmra.mxu0 %v358_v48  ;;  %v2376_v48 = vsel %vm2214_vm5, %v1624_v38, %v569_v39  ;;  %v2460_v33 = vsel %vm2214_vm5, %v1626_v22, %v577_v26  ;;  %v2041_v38 = vld [vmem:[%s2678_s1 + $0x238] sm:$0xff]  ;;  %v460_v22 = vpack.c.b16 %v454_v1, %v453_v63  ;;  %v2036_v63 = vld [vmem:[%s2678_s1 + $0x210] sm:$0xff] }
  0x2c   : > { %515 = vmatpush.bf16.msrb.mxu1 %v1977_v46  ;;  %905 = vmatpush.bf16.msrb.mxu0 %v2009_v53  ;;  %v276_v46 = vsel %vm2208_vm4, %v271_v34, %v275_v36  ;;  %v2387_v53 = vunpack.c.l.b16 %v318_v5  ;;  %v607_v57 = vunpack.c.l.b16 %v2376_v48  ;;  %v2017_v34 = vld [vmem:[%s2678_s1 + $0x178] sm:$0xff]  ;;  %v2002_v36 = vld [vmem:[%s2678_s1 + $0x100] sm:$0xff]  ;;  %v456_v5 = vunpack.c.l.b16 %v2165_v10  ;;  %v200_v48 = vld [vmem:[%s2156_s6 + $0x48] sm:$0xf] }
  0x2d   : > { %1127 = vmatpush.bf16.msrb.mxu2 %v2025_v55  ;;  %788 = vmatmul.bf16.vlgmr.msra.gmra.mxu3 %v724_v29  ;;  %v2391_v55 = vunpack.c.l.b16 %v262_v40  ;;  %v2393_v56 = vunpack.c.l.b16 %v276_v46  ;;  %v2020_v29 = vld [vmem:[%s2678_s1 + $0x190] sm:$0xff] }
  0x2e   : > { %676 = vmatmul.bf16.vlgmr.msra.gmra.mxu2 %v612_v49  ;;  %1246 = vmatpush.bf16.msrb.mxu3 %v2033_v15  ;;  %v2031_v49 = vld [vmem:[%s2678_s1 + $0x1e8] sm:$0xff]  ;;  %v2404_v61 = vpack.c.b16 %v2389_v54, %v2387_v53  ;;  %v2414_v4 = vpack.c.b16 %v607_v57, %v606_v31  ;;  %v725_v15 = vpack.c.b16 %v455_v2, %v454_v1  ;;  %v2040_v46 = vld [vmem:[%s2678_s1 + $0x230] sm:$0xff] }
  0x2f   : > { %v2408_v0 = vpack.c.b16 %v2393_v56, %v2391_v55  ;;  %v2003_v31 = vld [vmem:[%s2678_s1 + $0x108] sm:$0xff]  ;;  %v850_v26 = vpack.c.b16 %v2252_v13, %v2393_v56  ;;  %v2010_v56 = vld [vmem:[%s2678_s1 + $0x140] sm:$0xff] }
  0x30   : > { %516 = vmatpush.bf16.msrb.mxu1 %v1976_v7  ;;  %906 = vmatpush.bf16.msrb.mxu0 %v2008_v16  ;;  %v2004_v7 = vld [vmem:[%s2678_s1 + $0x110] sm:$0xff]  ;;  %v2021_v16 = vld [vmem:[%s2678_s1 + $0x198] sm:$0xff]  ;;  %v2011_v13 = vld [vmem:[%s2678_s1 + $0x148] sm:$0xff] }
  0x31   : > { %1128 = vmatpush.bf16.msrb.mxu2 %v2024_v21  ;;  %v573_v21 = vrot.slane %v2162_v9, 5  ;;  %v1970_v9 = vld [vmem:[%s2678_s1] sm:$0xff] }
  0x32   : > { %1247 = vmatpush.bf16.msrb.mxu3 %v2032_v42  ;;  %v609_v42 = vunpack.c.l.b16 %v2460_v33 }
  0x33   : > { %v2456_v12 = vsel %vm2214_vm5, %v1625_v19, %v573_v21  ;;  %v2539_v19 = vld [vmem:[%s2156_s6 + $0x40] sm:$0xf]  ;;  %v2012_v21 = vld [vmem:[%s2678_s1 + $0x150] sm:$0xff] }
  0x34   : > { %517 = vmatpush.bf16.msrb.mxu1 %v1975_v37  ;;  %907 = vmatpush.bf16.msrb.mxu0 %v2007_v43  ;;  %v451_v37 = vunpack.c.l.b16 %v2185_v20  ;;  %v608_v39 = vunpack.c.l.b16 %v2456_v12  ;;  %v2016_v43 = vld [vmem:[%s2678_s1 + $0x170] sm:$0xff]  ;;  %v849_v20 = vpack.c.b16 %v2391_v55, %v2270_v23  ;;  %v2019_v23 = vld [vmem:[%s2678_s1 + $0x188] sm:$0xff]  ;;  %v1628_v55 = vrot.slane %v2239_v3, 9 }
  0x35   : > { %1129 = vmatpush.bf16.msrb.mxu2 %v2023_v44  ;;  %v818_v1 = vshrl.u32 %v2539_v19, 16  ;;  %v1168_v12 = vshll.u32 %v200_v48, 16 }
  0x36   : > { %1248 = vmatpush.bf16.msrb.mxu3 %v2031_v49  ;;  %v459_v44 = vpack.c.b16 %v452_v62, %v451_v37  ;;  %v2487_v40 = vpack.c.b16 %v609_v42, %v608_v39  ;;  %v726_v62 = vpack.c.b16 %v457_v24, %v456_v5  ;;  %v2028_v49 = vld [vmem:[%s2678_s1 + $0x1d0] sm:$0xff]  ;;  %v966_v8 = vpack.c.b16 %v608_v39, %v607_v57 }
  0x37   : > { %v1165_v57 = vshrl.u32 %v200_v48, 16 }
  0x38   : > { %518 = vmatpush.bf16.msrb.mxu1 %v1974_v47  ;;  %908 = vmatpush.bf16.msrb.mxu0 %v2006_v50  ;;  %v2039_v47 = vld [vmem:[%s2678_s1 + $0x228] sm:$0xff]  ;;  %v1627_v50 = vrot.slane %v2224_v58, 9 }
  0x39   : > { %1130 = vmatpush.bf16.msrb.mxu2 %v2022_v52  ;;  %v581_v52 = vrot.slane %v2274_v25, 5  ;;  %v2027_v25 = vld [vmem:[%s2678_s1 + $0x1c8] sm:$0xff]  ;;  %v1167_v39 = vrot.slane %v1165_v57, 4 }
  0x3a   : > { %1249 = vmatpush.bf16.msrb.mxu3 %v2030_v17 }
  0x3b   : > { %437 = vmatmul.bf16.gmra.mxu1 %v2404_v61  ;;  %427 = vmatmul.bf16.gmra.mxu0 %v2408_v0 }
  0x3c   : > { %519 = vmatpush.bf16.msrb.mxu1 %v1973_v59  ;;  %909 = vmatpush.bf16.msrb.mxu0 %v2005_v60  ;;  %v585_v59 = vrot.slane %v2282_v30, 5  ;;  %v2018_v60 = vld [vmem:[%s2678_s1 + $0x180] sm:$0xff] }
  0x3d   : > { %1131 = vmatpush.bf16.msrb.mxu2 %v2021_v16  ;;  %793 = vmatmul.bf16.gmra.mxu3 %v725_v15  ;;  %v2038_v30 = vld [vmem:[%s2678_s1 + $0x220] sm:$0xff]  ;;  %v2013_v16 = vld [vmem:[%s2678_s1 + $0x158] sm:$0xff] }
  0x3e   : > { %681 = vmatmul.bf16.gmra.mxu2 %v2414_v4  ;;  %1250 = vmatpush.bf16.msrb.mxu3 %v2029_v32  ;;  %v2531_v15 = vsel %vm2214_vm5, %v1628_v55, %v585_v59  ;;  %v1918_v59 = vrot.slane %v200_v48, 9 }
  0x40   : > { %520 = vmatpush.bf16.msrb.mxu1 %v1972_v6  ;;  %910 = vmatpush.bf16.msrb.mxu0 %v2004_v7  ;;  %v2014_v6 = vld [vmem:[%s2678_s1 + $0x160] sm:$0xff]  ;;  %v2527_v7 = vsel %vm2214_vm5, %v1627_v50, %v581_v52 }
  0x41   : > { %1132 = vmatpush.bf16.msrb.mxu2 %v2020_v29  ;;  %v610_v17 = vunpack.c.l.b16 %v2527_v7  ;;  %v458_v29 = vunpack.c.l.b16 %v2239_v3  ;;  %v2037_v3 = vld [vmem:[%s2678_s1 + $0x218] sm:$0xff] }
  0x42   : > { %1251 = vmatpush.bf16.msrb.mxu3 %v2028_v49  ;;  %v1076_v49 = vunpack.c.l.b16 %v200_v48 }
  0x44   : > { %521 = vmatpush.bf16.msrb.mxu1 %v1971_v18  ;;  %911 = vmatpush.bf16.msrb.mxu0 %v2003_v31  ;;  %v611_v18 = vunpack.c.l.b16 %v2531_v15  ;;  %v723_v31 = vunpack.c.l.b16 %v2539_v19 }
  0x45   : > { %1133 = vmatpush.bf16.msrb.mxu2 %v2019_v23 }
  0x46   : > { %1252 = vmatpush.bf16.msrb.mxu3 %v2027_v25  ;;  %v2556_v32 = vpack.c.b16 %v611_v18, %v610_v17  ;;  %v727_v11 = vpack.c.b16 %v723_v31, %v458_v29  ;;  %v1077_v52 = vpack.c.b16 %v1076_v49, %v723_v31 }
  0x48   : > { %522 = vmatpush.bf16.msrb.mxu1 %v1970_v9  ;;  %912 = vmatpush.bf16.msrb.mxu0 %v2002_v36  ;;  %v821_v9 = vshll.u32 %v2539_v19, 16  ;;  %v820_v36 = vrot.slane %v818_v1, 4 }
  0x49   : > { %1134 = vmatpush.bf16.msrb.mxu2 %v2018_v60 }
  0x4a   : > { %1253 = vmatpush.bf16.msrb.mxu3 %v2026_v27  ;;  %v823_v37 = vrot.slane %v821_v9, 5 }
  0x4b   : > { %523 = vmatmul.bf16.vlgmr.msrb.gmra.mxu1 %v459_v44  ;;  %913 = vmatmul.bf16.vlgmr.msrb.gmra.mxu0 %v849_v20  ;;  %v851_v44 = vpack.c.b16 %v2387_v53, %v2254_v14  ;;  %v462_v53 = vpack.c.b16 %v458_v29, %v457_v24 }
  0x4c   : > { %1021 = vmatpush.bf16.msra.mxu1 %v2017_v34  ;;  %1356 = vmatpush.bf16.msra.mxu0 %v2041_v38  ;;  %v2035_v34 = vld [vmem:[%s2678_s1 + $0x208] sm:$0xff]  ;;  %v824_v20 = vor.u32 %v823_v37, %v820_v36 }
  0x4d   : > { %798 = vmatmul.bf16.gmra.mxu3 %v726_v62  ;;  %2073 = vmatpush.bf16.msra.mxu2 %v2041_v38  ;;  %v199_v38 = vld [vmem:[%s2156_s6 + $0x44] sm:$0x1] }
  0x4e   : > { %686 = vmatmul.bf16.gmra.mxu2 %v2487_v40  ;;  %v825_v23 = vrot.slane %v824_v20, 4  ;;  %v945_v55 = vrot.slane %v199_v38, 5 }
  0x50   : > { %1022 = vmatpush.bf16.msra.mxu1 %v2016_v43  ;;  %1357 = vmatpush.bf16.msra.mxu0 %v2040_v46  ;;  %v461_v43 = vpack.c.b16 %v456_v5, %v455_v2  ;;  %v201_v5 = vld [vmem:[%s2156_s6 + $0x4c] sm:$0x1]  ;;  %s1969_s6 = sshll.u32 %s2686_s13, 5 }
  0x51   : > { %2074 = vmatpush.bf16.msra.mxu2 %v2040_v46  ;;  %v827_v46 = vshll.u32 %v199_v38, 16  ;;  %v1174_v24 = vshll.u32 %v201_v5, 16  ;;  %s2653_s19 = scalar_lea.vmem %s2679_s2, %s1969_s6 }
  0x53   : > { %v829_v62 = vrot.slane %v827_v46, 5 }
  0x54   : > { %1023 = vmatpush.bf16.msra.mxu1 %v2015_v28  ;;  %1358 = vmatpush.bf16.msra.mxu0 %v2039_v47  ;;  %v2034_v28 = vld [vmem:[%s2678_s1 + $0x200] sm:$0xff] }
  0x55   : > { %2075 = vmatpush.bf16.msra.mxu2 %v2039_v47  ;;  %v830_v10 = vsel %vm2208_vm4, %v825_v23, %v829_v62  ;;  %v1176_v47 = vrot.slane %v1174_v24, 5 }
  0x56   : > { %v848_v14 = vunpack.c.l.b16 %v830_v10 }
  0x58   : > { %1024 = vmatpush.bf16.msra.mxu1 %v2014_v6  ;;  %1359 = vmatpush.bf16.msra.mxu0 %v2038_v30  ;;  %v852_v2 = vpack.c.b16 %v848_v14, %v2389_v54 }
  0x59   : > { %2076 = vmatpush.bf16.msra.mxu2 %v2038_v30 }
  0x5b   : > { %528 = vmatmul.bf16.gmra.mxu1 %v460_v22  ;;  %918 = vmatmul.bf16.gmra.mxu0 %v850_v26 }
  0x5c   : > { %1025 = vmatpush.bf16.msra.mxu1 %v2013_v16  ;;  %1360 = vmatpush.bf16.msra.mxu0 %v2037_v3 }
  0x5d   : > { %803 = vmatmul.bf16.gmra.mxu3 %v727_v11  ;;  %2077 = vmatpush.bf16.msra.mxu2 %v2037_v3 }
  0x5e   : > { %691 = vmatmul.bf16.gmra.mxu2 %v2556_v32 }
  0x60   : > { %1026 = vmatpush.bf16.msra.mxu1 %v2012_v21  ;;  %1361 = vmatpush.bf16.msra.mxu0 %v2036_v63 }
  0x61   : > { %2078 = vmatpush.bf16.msra.mxu2 %v2036_v63 }
  0x64   : > { %1027 = vmatpush.bf16.msra.mxu1 %v2011_v13  ;;  %1362 = vmatpush.bf16.msra.mxu0 %v2035_v34 }
  0x65   : > { %2079 = vmatpush.bf16.msra.mxu2 %v2035_v34 }
  0x68   : > { %1028 = vmatpush.bf16.msra.mxu1 %v2010_v56  ;;  %1363 = vmatpush.bf16.msra.mxu0 %v2034_v28 }
  0x69   : > { %2080 = vmatpush.bf16.msra.mxu2 %v2034_v28 }
  0x6b   : > { %533 = vmatmul.bf16.gmra.mxu1 %v461_v43  ;;  %923 = vmatmul.bf16.gmra.mxu0 %v851_v44 }
  0x6d   : > { %1254 = vmatmul.bf16.vlgmr.msrb.gmra.mxu3 %v2408_v0  ;;  %v1170_v0 = vrot.slane %v1168_v12, 5 }
  0x6e   : > { %1135 = vmatmul.bf16.vlgmr.msrb.gmra.mxu2 %v460_v22 }
  0x6f   : > { %v1171_v58 = vor.u32 %v1170_v0, %v1167_v39 }
  0x71   : > { %v1172_v54 = vrot.slane %v1171_v58, 4 }
  0x7b   : > { %538 = vmatmul.bf16.gmra.mxu1 %v462_v53  ;;  %928 = vmatmul.bf16.gmra.mxu0 %v852_v2 }
  0x7d   : > { %1259 = vmatmul.bf16.gmra.mxu3 %v2290_v35  ;;  %v1177_v35 = vsel %vm2208_vm4, %v1172_v54, %v1176_v47 }
  0x7e   : > { %1140 = vmatmul.bf16.gmra.mxu2 %v461_v43  ;;  %v1195_v50 = vunpack.c.l.b16 %v1177_v35 }
  0x8b   : > { %1029 = vmatmul.bf16.vlgmr.msra.gmra.mxu1 %v2352_v41  ;;  %1364 = vmatmul.bf16.vlgmr.msra.gmra.mxu0 %v2414_v4  ;;  %v1196_v41 = vpack.c.b16 %v1195_v50, %v848_v14  ;;  %v1773_v4 = vrot.slane %v2539_v19, 9 }
  0x8d   : > { %1264 = vmatmul.bf16.gmra.mxu3 %v2404_v61  ;;  %v1286_v61 = vrot.slane %v201_v5, 5  ;;  %v946_v60 = vsel %vm2214_vm5, %v1773_v4, %v945_v55 }
  0x8e   : > { %1145 = vmatmul.bf16.gmra.mxu2 %v462_v53  ;;  %v964_v6 = vunpack.c.l.b16 %v946_v60 }
  0x8f   : > { %v1287_v45 = vsel %vm2214_vm5, %v1918_v59, %v1286_v61 }
  0x90   : > { %v1305_v25 = vunpack.c.l.b16 %v1287_v45  ;;  %v968_v51 = vpack.c.b16 %v964_v6, %v611_v18 }
  0x92   : > { %v1306_v19 = vpack.c.b16 %v1305_v25, %v964_v6 }
  0x9b   : > { %1034 = vmatmul.bf16.gmra.mxu1 %v966_v8  ;;  %1369 = vmatmul.bf16.gmra.mxu0 %v2487_v40  ;;  %v967_v40 = vpack.c.b16 %v610_v17, %v609_v42 }
  0x9d   : > { %1269 = vmatmul.bf16.gmra.mxu3 %v1196_v41 }
  0x9e   : > { %1150 = vmatmul.bf16.gmra.mxu2 %v1077_v52 }
  0xa8   : > { %v433_v30 = vpop.f32.mrf.mxu1  ;;  %v423_v16 = vpop.f32.mrf.mxu0 }
  0xab   : > { %1039 = vmatmul.bf16.gmra.mxu1 %v967_v40  ;;  %1374 = vmatmul.bf16.gmra.mxu0 %v2556_v32 }
  0xae   : > { %1379 = vmatmul.bf16.vlgmr.msra.gmra.mxu2 %v1306_v19 }
  0xb0   : > { %v435_v22 = vpop.f32.mrf.mxu1  ;;  %v425_v26 = vpop.f32.mrf.mxu0 }
  0xb1   : > { %v677_v21 = vpop.f32.mrf.mxu2  ;;  %v789_v29 = vpop.f32.mrf.mxu3 }
  0xb8   : > { %v438_v11 = vpop.f32.mrf.mxu1  ;;  %v428_v33 = vpop.f32.mrf.mxu0 }
  0xb9   : > { %v679_v31 = vpop.f32.mrf.mxu2  ;;  %v2624_v13 = vpop.f32.mrf.mxu3 }
  0xbb   : > { %1044 = vmatmul.bf16.gmra.mxu1 %v968_v51 }
  0xc0   : > { %v440_v7 = vpop.f32.mrf.mxu1  ;;  %v430_v17 = vpop.f32.mrf.mxu0 }
  0xc1   : > { %v682_v42 = vpop.f32.mrf.mxu2  ;;  %v794_v3 = vpop.f32.mrf.mxu3 }
  0xc8   : > { %v524_v32 = vpop.f32.mrf.mxu1  ;;  %v914_v63 = vpop.f32.mrf.mxu0 }
  0xc9   : > { %v684_v27 = vpop.f32.mrf.mxu2  ;;  %v525_v56 = vadd.f32 %v524_v32, %v423_v16  ;;  %v2626_v9 = vpop.f32.mrf.mxu3 }
  0xcb   : > { %v697_v1 = vadd.f32 %v677_v21, %v525_v56 }
  0xcd   : > { %v809_v34 = vadd.f32 %v789_v29, %v697_v1 }
  0xcf   : > { %v934_v15 = vadd.f32 %v914_v63, %v809_v34 }
  0xd0   : > { %v526_v36 = vpop.f32.mrf.mxu1  ;;  %v916_v37 = vpop.f32.mrf.mxu0 }
  0xd1   : > { %v687_v18 = vpop.f32.mrf.mxu2  ;;  %v527_v38 = vadd.f32 %v526_v36, %v425_v26  ;;  %v799_v44 = vpop.f32.mrf.mxu3 }
  0xd3   : > { %v698_v43 = vadd.f32 %v679_v31, %v527_v38 }
  0xd8   : > { %v529_v46 = vpop.f32.mrf.mxu1  ;;  %v919_v28 = vpop.f32.mrf.mxu0 }
  0xd9   : > { %v689_v20 = vpop.f32.mrf.mxu2  ;;  %v530_v23 = vadd.f32 %v529_v46, %v428_v33  ;;  %v2628_v53 = vpop.f32.mrf.mxu3  ;;  %v810_v33 = vadd.f32 %v2624_v13, %v698_v43 }
  0xdb   : > { %v699_v62 = vadd.f32 %v682_v42, %v530_v23 }
  0xdd   : > { %v811_v8 = vadd.f32 %v794_v3, %v699_v62 }
  0xdf   : > { %v936_v10 = vadd.f32 %v919_v28, %v811_v8 }
  0xe0   : > { %v531_v2 = vpop.f32.mrf.mxu1  ;;  %v921_v48 = vpop.f32.mrf.mxu0 }
  0xe1   : > { %v692_v14 = vpop.f32.mrf.mxu2  ;;  %v532_v57 = vadd.f32 %v531_v2, %v430_v17  ;;  %v2630_v24 = vpop.f32.mrf.mxu3 }
  0xe3   : > { %v700_v12 = vadd.f32 %v684_v27, %v532_v57 }
  0xe8   : > { %v534_v0 = vpop.f32.mrf.mxu1  ;;  %v924_v5 = vpop.f32.mrf.mxu0 }
  0xe9   : > { %v694_v39 = vpop.f32.mrf.mxu2  ;;  %v535_v58 = vadd.f32 %v534_v0, %v433_v30  ;;  %v2638_v55 = vpop.f32.mrf.mxu3 }
  0xeb   : > { %v701_v54 = vadd.f32 %v687_v18, %v535_v58 }
  0xed   : > { %v813_v47 = vadd.f32 %v799_v44, %v701_v54 }
  0xef   : > { %v2632_v49 = vadd.f32 %v924_v5, %v813_v47 }
  0xf0   : > { %v536_v50 = vpop.f32.mrf.mxu1  ;;  %v2634_v52 = vpop.f32.mrf.mxu0 }
  0xf1   : > { %v1136_v35 = vpop.f32.mrf.mxu2  ;;  %v537_v41 = vadd.f32 %v536_v50, %v435_v22  ;;  %v1255_v25 = vpop.f32.mrf.mxu3 }
  0xf3   : > { %v2636_v4 = vadd.f32 %v689_v20, %v537_v41  ;;  %v812_v20 = vadd.f32 %v2626_v9, %v700_v12 }
  0xf8   : > { %v539_v61 = vpop.f32.mrf.mxu1  ;;  %v2640_v60 = vpop.f32.mrf.mxu0 }
  0xf9   : > { %v1138_v59 = vpop.f32.mrf.mxu2  ;;  %v540_v45 = vadd.f32 %v539_v61, %v438_v11  ;;  %v1257_v22 = vpop.f32.mrf.mxu3  ;;  %v935_v11 = vadd.f32 %v916_v37, %v810_v33 }
  0xfb   : > { %v2642_v6 = vadd.f32 %v692_v14, %v540_v45  ;;  %v937_v14 = vadd.f32 %v921_v48, %v812_v20 }
 0x100   : > { %v541_v30 = vpop.f32.mrf.mxu1  ;;  %v2644_v16 = vpop.f32.mrf.mxu0 }
 0x101   : > { %v1141_v40 = vpop.f32.mrf.mxu2  ;;  %v542_v19 = vadd.f32 %v541_v30, %v440_v7  ;;  %v1260_v63 = vpop.f32.mrf.mxu3 }
 0x103   : > { %v2646_v21 = vadd.f32 %v694_v39, %v542_v19 }
 0x108   : > { %v1030_v26 = vpop.f32.mrf.mxu1  ;;  %v1365_v29 = vpop.f32.mrf.mxu0 }
 0x109   : > { %v1050_v51 = vadd.f32 %v1030_v26, %v934_v15  ;;  %v1143_v31 = vpop.f32.mrf.mxu2  ;;  %v1262_v23 = vpop.f32.mrf.mxu3 }
 0x10b   : > { %v1156_v42 = vadd.f32 %v1136_v35, %v1050_v51 }
 0x10d   : > { %v1275_v17 = vadd.f32 %v1255_v25, %v1156_v42  ;;  %v814_v25 = vadd.f32 %v2628_v53, %v2636_v4 }
 0x10f   : > { %v1385_v1 = vadd.f32 %v1365_v29, %v1275_v17 }
 0x110   : > { %v1032_v3 = vpop.f32.mrf.mxu1  ;;  %v1367_v27 = vpop.f32.mrf.mxu0 }
 0x111   : > { %v1051_v32 = vadd.f32 %v1032_v3, %v935_v11  ;;  %v1146_v7 = vpop.f32.mrf.mxu2  ;;  %v1406_v36 = vmul.f32 %v1385_v1, %v1385_v1 }
 0x113   : > { %v1157_v56 = vadd.f32 %v1138_v59, %v1051_v32 }
 0x115   : > { %v1276_v34 = vadd.f32 %v1257_v22, %v1157_v56  ;;  %v939_v22 = vadd.f32 %v2634_v52, %v814_v25 }
 0x117   : > { %v1386_v18 = vadd.f32 %v1367_v27, %v1276_v34 }
 0x118   : > { %v1035_v13 = vpop.f32.mrf.mxu1  ;;  %v1370_v15 = vpop.f32.mrf.mxu0 }
 0x119   : > { %v1393_v37 = vadd.f32 %v1386_v18, %v1385_v1  ;;  %v1407_v38 = vmul.f32 %v1386_v18, %v1386_v18  ;;  %v2045_v43 = vpack.c.bf16 %v1386_v18, %v1385_v1  ;;  %v1052_v44 = vadd.f32 %v1035_v13, %v936_v10  ;;  %v1148_v8 = vpop.f32.mrf.mxu2  ;;  %v1265_v10 = vpop.f32.mrf.mxu3 }
 0x11a   : > { %v816_v18 = vadd.f32 %v2638_v55, %v2646_v21 }
 0x11b   : > { %v1414_v46 = vadd.f32 %v1407_v38, %v1406_v36  ;;  %2046 = vst [vmem:[%s2653_s19] sm:$0xff] %v2045_v43   ;;  %v1158_v28 = vadd.f32 %v1141_v40, %v1052_v44 }
 0x11d   : > { %v1277_v62 = vadd.f32 %v1260_v63, %v1158_v28 }
 0x11f   : > { %v1387_v2 = vadd.f32 %v1370_v15, %v1277_v62  ;;  %v941_v15 = vadd.f32 %v2644_v16, %v816_v18 }
 0x120   : > { %v1037_v57 = vpop.f32.mrf.mxu1  ;;  %v1372_v39 = vpop.f32.mrf.mxu0 }
 0x121   : > { %v1394_v0 = vadd.f32 %v1393_v37, %v1387_v2  ;;  %v1408_v5 = vmul.f32 %v1387_v2, %v1387_v2  ;;  %v1053_v58 = vadd.f32 %v1037_v57, %v937_v14  ;;  %v1151_v9 = vpop.f32.mrf.mxu2  ;;  %v1267_v29 = vpop.f32.mrf.mxu3 }
 0x123   : > { %v1415_v54 = vadd.f32 %v1414_v46, %v1408_v5  ;;  %v1159_v47 = vadd.f32 %v1143_v31, %v1053_v58 }
 0x125   : > { %v1278_v35 = vadd.f32 %v1262_v23, %v1159_v47 }
 0x127   : > { %v1388_v50 = vadd.f32 %v1372_v39, %v1278_v35 }
 0x128   : > { %v1040_v12 = vpop.f32.mrf.mxu1  ;;  %v1375_v48 = vpop.f32.mrf.mxu0 }
 0x129   : > { %v1395_v41 = vadd.f32 %v1394_v0, %v1388_v50  ;;  %v1409_v59 = vmul.f32 %v1388_v50, %v1388_v50  ;;  %v2050_v61 = vpack.c.bf16 %v1388_v50, %v1387_v2  ;;  %v1054_v45 = vadd.f32 %v1040_v12, %v2632_v49  ;;  %v1153_v11 = vpop.f32.mrf.mxu2  ;;  %v1270_v34 = vpop.f32.mrf.mxu3 }
 0x12a   : > { %v815_v49 = vadd.f32 %v2630_v24, %v2642_v6 }
 0x12b   : > { %v1416_v40 = vadd.f32 %v1415_v54, %v1409_v59  ;;  %2062 = vst [vmem:[%s2653_s19 + $0x8] sm:$0xff] %v2050_v61   ;;  %v1160_v30 = vadd.f32 %v1146_v7, %v1054_v45 }
 0x12c   : > { %v940_v27 = vadd.f32 %v2640_v60, %v815_v49 }
 0x12d   : > { %v1279_v19 = vadd.f32 %v1265_v10, %v1160_v30 }
 0x12f   : > { %v1389_v26 = vadd.f32 %v1375_v48, %v1279_v19 }
 0x130   : > { %v1042_v51 = vpop.f32.mrf.mxu1  ;;  %v1377_v53 = vpop.f32.mrf.mxu0 }
 0x131   : > { %v1396_v31 = vadd.f32 %v1395_v41, %v1389_v26  ;;  %v1410_v33 = vmul.f32 %v1389_v26, %v1389_v26  ;;  %v1055_v42 = vadd.f32 %v1042_v51, %v939_v22  ;;  %v1380_v24 = vpop.f32.mrf.mxu2  ;;  %v1272_v28 = vpop.f32.mrf.mxu3 }
 0x133   : > { %v1417_v17 = vadd.f32 %v1416_v40, %v1410_v33  ;;  %v1161_v3 = vadd.f32 %v1148_v8, %v1055_v42 }
 0x135   : > { %v1280_v4 = vadd.f32 %v1267_v29, %v1161_v3 }
 0x137   : > { %v1390_v32 = vadd.f32 %v1377_v53, %v1280_v4 }
 0x138   : > { %v1045_v63 = vpop.f32.mrf.mxu1 }
 0x139   : > { %v1397_v52 = vadd.f32 %v1396_v31, %v1390_v32  ;;  %v1411_v56 = vmul.f32 %v1390_v32, %v1390_v32  ;;  %v2055_v1 = vpack.c.bf16 %v1390_v32, %v1389_v26  ;;  %v1056_v7 = vadd.f32 %v1045_v63, %v940_v27  ;;  %v1382_v62 = vpop.f32.mrf.mxu2 }
 0x13b   : > { %v1418_v36 = vadd.f32 %v1417_v17, %v1411_v56  ;;  %2063 = vst [vmem:[%s2653_s19 + $0x10] sm:$0xff] %v2055_v1   ;;  %v1162_v13 = vadd.f32 %v1151_v9, %v1056_v7 }
 0x13d   : > { %v1281_v6 = vadd.f32 %v1270_v34, %v1162_v13 }
 0x13f   : > { %v1391_v37 = vadd.f32 %v1380_v24, %v1281_v6 }
 0x140   : > { %v1047_v60 = vpop.f32.mrf.mxu1 }
 0x141   : > { %v1398_v38 = vadd.f32 %v1397_v52, %v1391_v37  ;;  %v1412_v43 = vmul.f32 %v1391_v37, %v1391_v37  ;;  %v1057_v44 = vadd.f32 %v1047_v60, %v941_v15 }
 0x143   : > { %v1419_v20 = vadd.f32 %v1418_v36, %v1412_v43  ;;  %v1163_v46 = vadd.f32 %v1153_v11, %v1057_v44 }
 0x145   : > { %v1282_v23 = vadd.f32 %v1272_v28, %v1163_v46 }
 0x147   : > { %v1392_v55 = vadd.f32 %v1382_v62, %v1282_v23 }
 0x149   : > { %v1399_v21 = vadd.f32 %v1398_v38, %v1392_v55  ;;  %v1413_v8 = vmul.f32 %v1392_v55, %v1392_v55  ;;  %v2060_v14 = vpack.c.bf16 %v1392_v55, %v1391_v37 }
 0x14b   : > { %v1400_v2 = vrot.slane %v1399_v21, 4  ;;  %v1420_v57 = vadd.f32 %v1419_v20, %v1413_v8  ;;  %2064 = vst [vmem:[%s2653_s19 + $0x18] sm:$0xff] %v2060_v14  }
 0x14d   : > { %v1401_v16 = vadd.f32 %v1400_v2, %v1399_v21  ;;  %v1421_v39 = vrot.slane %v1420_v57, 4 }
 0x14f   : > { %v1402_v0 = vrot.slane %v1401_v16, 2  ;;  %v1422_v5 = vadd.f32 %v1421_v39, %v1420_v57 }
 0x151   : > { %v1403_v58 = vadd.f32 %v1402_v0, %v1401_v16  ;;  %v1423_v54 = vrot.slane %v1422_v5, 2 }
 0x153   : > { %v1404_v47 = vrot.slane %v1403_v58, 1  ;;  %v1424_v35 = vadd.f32 %v1423_v54, %v1422_v5 }
 0x155   : > { %v1425_v10 = vrot.slane %v1424_v35, 1  ;;  %v1405_v50 = vadd.f32 %v1404_v47, %v1403_v58 }
 0x157   : > { %v1426_v9 = vadd.f32 %v1425_v10, %v1424_v35 }
 0x159   : > { %v1428_v12 = vsel %vm1427_vm6, %v1405_v50, %v1426_v9 }
 0x15a   : > { %1429 = vst [vmem:[%s181_s23] sm:$0x3] %v1428_v12 }
 0x15b PF: > { %s14_s12 = sadd.s32 1, %s2096_s12  }
 0x15c   : > { %p11_p4 = scmp.ge.s32.totalorder %s14_s12, 4  }
 0x15e   :  { %13 = sbr.rel (!%p11_p4) target bundleno = 1 (0x1), region = 78 }

</bundles_post_ra>
